<compile_context>
chip_gen: v6e
topology: v6e:2x2x1
jax: 0.10.0
libtpu: 0.0.40
codegen_flags: <defaults>
</compile_context>

<pallas_src>
import numpy as np
import jax
import jax.numpy as jnp
from jax.experimental import pallas as pl
from jax.experimental.pallas import tpu as pltpu

EPS = 1e-5        # PyTorch BatchNorm1d default eps
LANE = 128        # TPU lane width

# Phase-1 ("leaf") nets, in stacked-weight / grid order.
PHASE1_NETS = ("user_user", "user_irs", "user_bs",
               "irs_ue", "irs_bs", "bs_ue", "bs_irs")


def _round_up(n, m=LANE):
    return ((n + m - 1) // m) * m


def _pad_last(a, to):
    pad = to - a.shape[-1]
    if pad == 0:
        return a
    return jnp.pad(a, [(0, 0)] * (a.ndim - 1) + [(0, pad)])


# ---------------------------------------------------------------------------
# Grouped "Net" kernel.  One grid step == ONE net applied to G groups of B rows
# (all groups stacked into the matmul M dimension; BN stats per group).
# ---------------------------------------------------------------------------
def net_kernel(x_ref, w1_ref, g1_ref, be1_ref, w2_ref, g2_ref, be2_ref, o_ref):
    """(Linear -> BatchNorm(batch stats) -> Sigmoid) x2 for one net's groups.

    x_ref : (G, B, K)   G node-groups of B rows each.
    w1_ref: (K, H); g1/be1: (1, H); w2_ref: (H, D); g2/be2: (1, D).
    o_ref : (G, B, D).
    Linear biases are omitted: they cancel under the following BatchNorm.
    """
    G, B, K = x_ref.shape
    inv_n = 1.0 / B

    # layer1: stack groups into M (G*B rows) for a single MXU matmul.
    h2 = jnp.dot(x_ref[...].reshape(G * B, K), w1_ref[...],
                 preferred_element_type=jnp.float32)                # (G*B, H)
    h = h2.reshape(G, B, h2.shape[-1])

    # BatchNorm1d(hidden): per-group batch stats, single pass, fused affine.
    mu1 = jnp.sum(h, axis=1, keepdims=True) * inv_n                 # (G, 1, H)
    var1 = jnp.maximum(jnp.sum(h * h, axis=1, keepdims=True) * inv_n - mu1 * mu1, 0.0)
    scale1 = g1_ref[...].reshape(1, 1, -1) * jax.lax.rsqrt(var1 + EPS)
    shift1 = be1_ref[...].reshape(1, 1, -1) - mu1 * scale1
    h = jax.nn.sigmoid(h * scale1 + shift1)

    # layer2
    o2 = jnp.dot(h.reshape(G * B, -1), w2_ref[...],
                 preferred_element_type=jnp.float32)                # (G*B, D)
    o = o2.reshape(G, B, o2.shape[-1])

    mu2 = jnp.sum(o, axis=1, keepdims=True) * inv_n
    var2 = jnp.maximum(jnp.sum(o * o, axis=1, keepdims=True) * inv_n - mu2 * mu2, 0.0)
    scale2 = g2_ref[...].reshape(1, 1, -1) * jax.lax.rsqrt(var2 + EPS)
    shift2 = be2_ref[...].reshape(1, 1, -1) - mu2 * scale2
    o_ref[...] = jax.nn.sigmoid(o * scale2 + shift2)


def net_apply_stacked(xg, kp):
    """Apply n_nets independent Nets, one per grid step (weights grid-indexed).

    xg: (n_nets, G, B, K) float32 lane-padded activations.
    kp: stacked lane-padded params: w1 (n_nets,K,H), g1/be1 (n_nets,1,H),
        w2 (n_nets,H,D), g2/be2 (n_nets,1,D).
    Returns (n_nets, G, B, D) float32.
    """
    n_nets, G, B, K = xg.shape
    H = kp["w1"].shape[-1]
    D = kp["w2"].shape[-1]
    assert kp["w1"].shape == (n_nets, K, H)

    # NOTE: a further v6e/v7x MXU-N optimization would pair nets sharing an input into
    # 128x256 weight tiles (block-diag w2, per-half BN); skipped for simplicity.
    return pl.pallas_call(
        net_kernel,
        out_shape=jax.ShapeDtypeStruct((n_nets, G, B, D), jnp.float32),
        grid=(n_nets,),
        in_specs=[
            pl.BlockSpec((None, G, B, K), lambda n: (n, 0, 0, 0)),   # activations of net n
            pl.BlockSpec((None, K, H), lambda n: (n, 0, 0)),          # w1[n]
            pl.BlockSpec((None, 1, H), lambda n: (n, 0, 0)),          # gamma1[n]
            pl.BlockSpec((None, 1, H), lambda n: (n, 0, 0)),          # beta1[n]
            pl.BlockSpec((None, H, D), lambda n: (n, 0, 0)),          # w2[n]
            pl.BlockSpec((None, 1, D), lambda n: (n, 0, 0)),          # gamma2[n]
            pl.BlockSpec((None, 1, D), lambda n: (n, 0, 0)),          # beta2[n]
        ],
        out_specs=pl.BlockSpec((None, G, B, D), lambda n: (n, 0, 0, 0)),
        compiler_params=pltpu.CompilerParams(
            dimension_semantics=("parallel",)),      # nets independent
    )(xg, kp["w1"], kp["g1"], kp["be1"], kp["w2"], kp["g2"], kp["be2"])


# ---------------------------------------------------------------------------
# Graph_layer forward: 2 pallas_calls + lane-dense JAX glue.
# ---------------------------------------------------------------------------
def _graph_layer_forward(x, kp1, kpc, size_output):
    """x: (B, N, d_in) float32.  Mirrors Graph_layer.forward (training-mode BN)."""
    x = x.astype(jnp.float32)
    B, N, _ = x.shape
    U = N - 2                                       # number of user nodes
    O = size_output
    n_nets = len(PHASE1_NETS)
    din_p = kp1["w1"].shape[1]
    dout_p = kp1["w2"].shape[-1]
    din_c = kpc["w1"].shape[1]
    assert din_c == 3 * dout_p + din_p

    # Pad features to the lane width ONCE; node-major layout (N, B, din_p).
    x_nodes = _pad_last(jnp.transpose(x, (1, 0, 2)), din_p)

    # ---- Phase 1: the seven leaf nets in ONE call, grid over nets -------------
    # user_user deduped: the output depends only on the node (BN stats per call),
    # so evaluate the U+1 distinct nodes once instead of U^2 (node, order) pairs.
    Gmax = U + 1
    node_tbl = np.zeros((n_nets, Gmax), dtype=np.int32)
    node_tbl[0, :U + 1] = np.arange(U + 1)          # user_user : nodes 0..U (incl. IRS)
    node_tbl[1, 0] = N - 2                          # user_irs  : IRS node
    node_tbl[2, 0] = N - 1                          # user_bs   : BS node
    node_tbl[3, :U] = np.arange(U)                  # irs_ue    : user nodes
    node_tbl[4, 0] = N - 1                          # irs_bs    : BS node
    node_tbl[5, :U] = np.arange(U)                  # bs_ue     : user nodes
    node_tbl[6, 0] = N - 2                          # bs_irs    : IRS node
    xg = jnp.take(x_nodes, jnp.asarray(node_tbl.reshape(-1)), axis=0)
    xg = xg.reshape(n_nets, Gmax, B, din_p)

    p1 = net_apply_stacked(xg, kp1)                 # (7, Gmax, B, dout_p)

    u_all = p1[0]                                   # user_user(node j), j = 0..U
    irs_feat = p1[1, 0]                             # user_irs(x_irs)      (B, dout_p)
    bs_feat = p1[2, 0]                              # user_bs(x_bs)
    irs_agg = jnp.mean(p1[3, :U], axis=0)           # mean_j irs_ue(user_j)
    irs_bs_feat = p1[4, 0]                          # irs_bs(x_bs)
    bs_agg = jnp.mean(p1[5, :U], axis=0)            # mean_j bs_ue(user_j)
    bs_irs_feat = p1[6, 0]                          # bs_irs(x_irs)

    # Per-order masked max over cached user_user outputs (order ii excludes node ii).
    excl = jnp.arange(U)[:, None] == jnp.arange(U + 1)[None, :]          # (U, U+1)
    agg_user = jnp.max(jnp.where(excl[:, :, None, None], -jnp.inf, u_all[None]),
                       axis=1)                                           # (U, B, dout_p)

    # ---- Phase 2: the three combine nets in ONE call --------------------------
    # Lane-aligned segment layout [agg | featA | featB | self-x]; the stacked combine
    # w1 has its rows relocated to the matching 128-lane offsets (zeros elsewhere).
    comb_user = jnp.concatenate(
        [agg_user,
         jnp.broadcast_to(irs_feat, (U, B, dout_p)),
         jnp.broadcast_to(bs_feat, (U, B, dout_p)),
         x_nodes[:U]], axis=-1)                                          # (U, B, din_c)
    zeros_seg = jnp.zeros((B, dout_p), jnp.float32)
    comb_irs = jnp.concatenate([irs_agg, irs_bs_feat, zeros_seg, x_nodes[N - 2]], axis=-1)
    comb_bs = jnp.concatenate([bs_agg, bs_irs_feat, zeros_seg, x_nodes[N - 1]], axis=-1)
    comb_in = jnp.stack([comb_user,
                         jnp.broadcast_to(comb_irs, comb_user.shape),
                         jnp.broadcast_to(comb_bs, comb_user.shape)], axis=0)  # (3,U,B,din_c)

    p2 = net_apply_stacked(comb_in, kpc)            # (3, U, B, dout_p)

    out = jnp.concatenate([jnp.transpose(p2[0], (1, 0, 2)),   # user rows 0..U-1
                           p2[1, 0][:, None, :],              # IRS row (N-2)
                           p2[2, 0][:, None, :]], axis=1)     # BS  row (N-1)
    return out[..., :O]


graph_layer_forward = jax.jit(_graph_layer_forward, static_argnums=(3,))


# ---------------------------------------------------------------------------
# Parameter init (PyTorch-default-style) + kernel-side preparation
# ---------------------------------------------------------------------------
def init_net_params(key, d_in, d_out, hidden):
    """Uniform +-1/sqrt(fan_in) Linear init, gamma=1 / beta=0 BN init.  Biases b1/b2
    are kept for the reference; the kernel drops them (they cancel under BN)."""
    k1, k2, k3, k4 = jax.random.split(key, 4)
    lim1 = 1.0 / float(np.sqrt(d_in))
    lim2 = 1.0 / float(np.sqrt(hidden))
    return {
        "w1": jax.random.uniform(k1, (d_in, hidden), jnp.float32, -lim1, lim1),
        "b1": jax.random.uniform(k2, (1, hidden), jnp.float32, -lim1, lim1),
        "g1": jnp.ones((1, hidden), jnp.float32),
        "be1": jnp.zeros((1, hidden), jnp.float32),
        "w2": jax.random.uniform(k3, (hidden, d_out), jnp.float32, -lim2, lim2),
        "b2": jax.random.uniform(k4, (1, d_out), jnp.float32, -lim2, lim2),
        "g2": jnp.ones((1, d_out), jnp.float32),
        "be2": jnp.zeros((1, d_out), jnp.float32),
    }


def init_graph_layer_params(key, d_in, d_out, hidden=128):
    dims = {
        "user_user": d_in, "user_irs": d_in, "user_bs": d_in,
        "user_combine": 3 * d_out + d_in,
        "irs_ue": d_in, "irs_bs": d_in, "irs_combine": 2 * d_out + d_in,
        "bs_ue": d_in, "bs_irs": d_in, "bs_combine": 2 * d_out + d_in,
    }
    keys = jax.random.split(key, len(dims))
    return {name: init_net_params(k, di, d_out, hidden)
            for (name, di), k in zip(dims.items(), keys)}


_KP_KEYS = ("w1", "g1", "be1", "w2", "g2", "be2")


def _pad_one_net(p, d_in, hidden, d_out):
    din_p, h_p, dout_p = _round_up(d_in), _round_up(hidden), _round_up(d_out)
    w1 = jnp.zeros((din_p, h_p), jnp.float32).at[:d_in, :hidden].set(p["w1"])
    w2 = jnp.zeros((h_p, dout_p), jnp.float32).at[:hidden, :d_out].set(p["w2"])
    return (w1, _pad_last(p["g1"], h_p), _pad_last(p["be1"], h_p),
            w2, _pad_last(p["g2"], dout_p), _pad_last(p["be2"], dout_p))


def prep_phase1_params(raw, d_in, d_out, hidden):
    """Stack the seven leaf nets' lane-padded weights along a leading net axis."""
    nets = [_pad_one_net(raw[name], d_in, hidden, d_out) for name in PHASE1_NETS]
    return {k: jnp.stack(list(v), axis=0) for k, v in zip(_KP_KEYS, zip(*nets))}


def prep_combine_params(raw, d_in, d_out, hidden):
    """Stack the three combine nets with their w1 rows moved to 128-lane segment
    offsets [agg | featA | featB | self-x] so kernel inputs stay lane-aligned.
    Rows/lanes outside the real weights are zero (keeps padded 0.5 lanes inert)."""
    din_p, h_p, dout_p = _round_up(d_in), _round_up(hidden), _round_up(d_out)
    din_c = 3 * dout_p + din_p
    segs_user = [(0, d_out, 0), (d_out, 2 * d_out, dout_p),
                 (2 * d_out, 3 * d_out, 2 * dout_p),
                 (3 * d_out, 3 * d_out + d_in, 3 * dout_p)]
    segs_pair = [(0, d_out, 0), (d_out, 2 * d_out, dout_p),
                 (2 * d_out, 2 * d_out + d_in, 3 * dout_p)]

    def one(p, segs):
        w1 = jnp.zeros((din_c, h_p), jnp.float32)
        for (s0, s1, d0) in segs:
            w1 = w1.at[d0:d0 + (s1 - s0), :hidden].set(p["w1"][s0:s1])
        w2 = jnp.zeros((h_p, dout_p), jnp.float32).at[:hidden, :d_out].set(p["w2"])
        return (w1, _pad_last(p["g1"], h_p), _pad_last(p["be1"], h_p),
                w2, _pad_last(p["g2"], dout_p), _pad_last(p["be2"], dout_p))

    nets = [one(raw["user_combine"], segs_user),
            one(raw["irs_combine"], segs_pair),
            one(raw["bs_combine"], segs_pair)]
    return {k: jnp.stack(list(v), axis=0) for k, v in zip(_KP_KEYS, zip(*nets))}


# ---------------------------------------------------------------------------
# Pure-JAX reference (direct transcription of the PyTorch forward, f32)
# ---------------------------------------------------------------------------
def _net_ref(x, p):
    h = x @ p["w1"] + p["b1"]
    mu = h.mean(0, keepdims=True)
    var = ((h - mu) ** 2).mean(0, keepdims=True)
    h = jax.nn.sigmoid((h - mu) / jnp.sqrt(var + EPS) * p["g1"] + p["be1"])
    o = h @ p["w2"] + p["b2"]
    mu2 = o.mean(0, keepdims=True)
    var2 = ((o - mu2) ** 2).mean(0, keepdims=True)
    return jax.nn.sigmoid((o - mu2) / jnp.sqrt(var2 + EPS) * p["g2"] + p["be2"])


def graph_layer_ref(x, P):
    B, N, _ = x.shape
    U = N - 2
    rows = []
    for order in range(U):                                   # User_block with order=ii
        outs = [_net_ref(x[:, (jj if jj < order else jj + 1), :], P["user_user"])
                for jj in range(U)]
        agg = jnp.max(jnp.stack(outs, axis=1), axis=1)       # operation='max'
        cat = jnp.concatenate([agg,
                               _net_ref(x[:, -2, :], P["user_irs"]),
                               _net_ref(x[:, -1, :], P["user_bs"]),
                               x[:, order, :]], axis=1)
        rows.append(_net_ref(cat, P["user_combine"]))
    # IRS_block (operation='mean')
    outs = [_net_ref(x[:, jj, :], P["irs_ue"]) for jj in range(U)]
    agg = jnp.mean(jnp.stack(outs, axis=1), axis=1)
    cat = jnp.concatenate([agg, _net_ref(x[:, -1, :], P["irs_bs"]), x[:, -2, :]], axis=1)
    rows.append(_net_ref(cat, P["irs_combine"]))
    # BS_block (operation='mean')
    outs = [_net_ref(x[:, jj, :], P["bs_ue"]) for jj in range(U)]
    agg = jnp.mean(jnp.stack(outs, axis=1), axis=1)
    cat = jnp.concatenate([agg, _net_ref(x[:, -2, :], P["bs_irs"]), x[:, -1, :]], axis=1)
    rows.append(_net_ref(cat, P["bs_combine"]))
    return jnp.stack(rows, axis=1)


if __name__ == "__main__":
    B, N_NODES, D_IN, D_OUT, HIDDEN = 8, 5, 16, 8, 128   # blocks use hidden=128 (module default)

    key = jax.random.PRNGKey(0)
    kx, kp = jax.random.split(key)
    x = jax.random.normal(kx, (B, N_NODES, D_IN), dtype=jnp.float32)

    raw_params = init_graph_layer_params(kp, D_IN, D_OUT, hidden=HIDDEN)
    kp1 = prep_phase1_params(raw_params, D_IN, D_OUT, HIDDEN)
    kpc = prep_combine_params(raw_params, D_IN, D_OUT, HIDDEN)

    out = graph_layer_forward(x, kp1, kpc, D_OUT)
    out = jax.block_until_ready(out)

    ref = graph_layer_ref(x, raw_params)
    assert out.shape == (B, N_NODES, D_OUT)
    max_err = float(jnp.max(jnp.abs(out - ref)))
    assert jnp.allclose(out, ref, atol=1e-3, rtol=1e-3), \
        f"mismatch vs reference (max|err|={max_err})"

    print("KERNEL_OK")
</pallas_src>

<mosaic_0001>
module attributes {stable_mosaic.version = 11 : i64} {
  func.func @net_kernel(%arg0: i32, %arg1: memref<1x4x8x128xf32, #tpu.memory_space<vmem>>, %arg2: memref<1x128x128xf32, #tpu.memory_space<vmem>>, %arg3: memref<1x1x128xf32, #tpu.memory_space<vmem>>, %arg4: memref<1x1x128xf32, #tpu.memory_space<vmem>>, %arg5: memref<1x128x128xf32, #tpu.memory_space<vmem>>, %arg6: memref<1x1x128xf32, #tpu.memory_space<vmem>>, %arg7: memref<1x1x128xf32, #tpu.memory_space<vmem>>, %arg8: memref<1x4x8x128xf32, #tpu.memory_space<vmem>>) attributes {dimension_semantics = [#tpu.dimension_semantics<parallel>], iteration_bounds = array<i64: 7>, scalar_prefetch = 0 : i64, scratch_operands = 0 : i64, tpu.core_type = #tpu.core_type<tc>, window_params = [{transform_indices = @transform_0, window_bounds = array<i64: 1, 4, 8, 128>}, {transform_indices = @transform_1, window_bounds = array<i64: 1, 128, 128>}, {transform_indices = @transform_2, window_bounds = array<i64: 1, 1, 128>}, {transform_indices = @transform_3, window_bounds = array<i64: 1, 1, 128>}, {transform_indices = @transform_4, window_bounds = array<i64: 1, 128, 128>}, {transform_indices = @transform_5, window_bounds = array<i64: 1, 1, 128>}, {transform_indices = @transform_6, window_bounds = array<i64: 1, 1, 128>}, {transform_indices = @transform_7, window_bounds = array<i64: 1, 4, 8, 128>}]} {
    %c0 = arith.constant 0 : index
    %c0_0 = arith.constant 0 : index
    %c0_1 = arith.constant 0 : index
    %c0_2 = arith.constant 0 : index
    %0 = vector.load %arg1[%c0, %c0_0, %c0_1, %c0_2] : memref<1x4x8x128xf32, #tpu.memory_space<vmem>>, vector<1x4x8x128xf32>
    %1 = vector.shape_cast %0 : vector<1x4x8x128xf32> to vector<4x8x128xf32>
    %2 = vector.shape_cast %1 : vector<4x8x128xf32> to vector<32x128xf32>
    %c0_3 = arith.constant 0 : index
    %c0_4 = arith.constant 0 : index
    %c0_5 = arith.constant 0 : index
    %3 = vector.load %arg2[%c0_3, %c0_4, %c0_5] : memref<1x128x128xf32, #tpu.memory_space<vmem>>, vector<1x128x128xf32>
    %4 = vector.shape_cast %3 : vector<1x128x128xf32> to vector<128x128xf32>
    %cst = arith.constant dense<0.000000e+00> : vector<32x128xf32>
    %5 = tpu.matmul %2, %4, %cst {dimension_numbers = #tpu.dot_dimension_numbers<[1], [0], [0], [1], [0, 0, 1, 1], [], []>} : vector<32x128xf32>, vector<128x128xf32>, vector<32x128xf32> -> vector<32x128xf32>
    %6 = vector.shape_cast %5 : vector<32x128xf32> to vector<4x8x128xf32>
    %cst_6 = arith.constant dense<0.000000e+00> : vector<4x128xf32>
    %7 = vector.multi_reduction <add>, %6, %cst_6 [1] : vector<4x8x128xf32> to vector<4x128xf32>
    %8 = vector.shape_cast %7 : vector<4x128xf32> to vector<4x1x128xf32>
    %cst_7 = arith.constant 1.250000e-01 : f32
    %9 = vector.broadcast %cst_7 : f32 to vector<4x1x128xf32>
    %10 = arith.mulf %8, %9 : vector<4x1x128xf32>
    %11 = arith.mulf %6, %6 : vector<4x8x128xf32>
    %cst_8 = arith.constant dense<0.000000e+00> : vector<4x128xf32>
    %12 = vector.multi_reduction <add>, %11, %cst_8 [1] : vector<4x8x128xf32> to vector<4x128xf32>
    %13 = vector.shape_cast %12 : vector<4x128xf32> to vector<4x1x128xf32>
    %cst_9 = arith.constant 1.250000e-01 : f32
    %14 = vector.broadcast %cst_9 : f32 to vector<4x1x128xf32>
    %15 = arith.mulf %13, %14 : vector<4x1x128xf32>
    %16 = arith.mulf %10, %10 : vector<4x1x128xf32>
    %17 = arith.subf %15, %16 : vector<4x1x128xf32>
    %cst_10 = arith.constant 0.000000e+00 : f32
    %18 = vector.broadcast %cst_10 : f32 to vector<4x1x128xf32>
    %19 = arith.maximumf %17, %18 : vector<4x1x128xf32>
    %c0_11 = arith.constant 0 : index
    %c0_12 = arith.constant 0 : index
    %c0_13 = arith.constant 0 : index
    %20 = vector.load %arg3[%c0_11, %c0_12, %c0_13] : memref<1x1x128xf32, #tpu.memory_space<vmem>>, vector<1x1x128xf32>
    %21 = vector.shape_cast %20 : vector<1x1x128xf32> to vector<1x128xf32>
    %22 = vector.shape_cast %21 : vector<1x128xf32> to vector<1x1x128xf32>
    %cst_14 = arith.constant 9.99999974E-6 : f32
    %23 = vector.broadcast %cst_14 : f32 to vector<4x1x128xf32>
    %24 = arith.addf %19, %23 : vector<4x1x128xf32>
    %25 = math.rsqrt %24 : vector<4x1x128xf32>
    %26 = vector.broadcast %22 : vector<1x1x128xf32> to vector<4x1x128xf32>
    %27 = arith.mulf %26, %25 : vector<4x1x128xf32>
    %c0_15 = arith.constant 0 : index
    %c0_16 = arith.constant 0 : index
    %c0_17 = arith.constant 0 : index
    %28 = vector.load %arg4[%c0_15, %c0_16, %c0_17] : memref<1x1x128xf32, #tpu.memory_space<vmem>>, vector<1x1x128xf32>
    %29 = vector.shape_cast %28 : vector<1x1x128xf32> to vector<1x128xf32>
    %30 = vector.shape_cast %29 : vector<1x128xf32> to vector<1x1x128xf32>
    %31 = arith.mulf %10, %27 : vector<4x1x128xf32>
    %32 = vector.broadcast %30 : vector<1x1x128xf32> to vector<4x1x128xf32>
    %33 = arith.subf %32, %31 : vector<4x1x128xf32>
    %34 = vector.broadcast %27 : vector<4x1x128xf32> to vector<4x8x128xf32>
    %35 = arith.mulf %6, %34 : vector<4x8x128xf32>
    %36 = vector.broadcast %33 : vector<4x1x128xf32> to vector<4x8x128xf32>
    %37 = arith.addf %35, %36 : vector<4x8x128xf32>
    %38 = arith.negf %37 : vector<4x8x128xf32>
    %39 = math.exp %38 : vector<4x8x128xf32>
    %cst_18 = arith.constant 1.000000e+00 : f32
    %40 = vector.broadcast %cst_18 : f32 to vector<4x8x128xf32>
    %41 = arith.addf %40, %39 : vector<4x8x128xf32>
    %42 = arith.divf %40, %41 : vector<4x8x128xf32>
    %43 = vector.shape_cast %42 : vector<4x8x128xf32> to vector<32x128xf32>
    %c0_19 = arith.constant 0 : index
    %c0_20 = arith.constant 0 : index
    %c0_21 = arith.constant 0 : index
    %44 = vector.load %arg5[%c0_19, %c0_20, %c0_21] : memref<1x128x128xf32, #tpu.memory_space<vmem>>, vector<1x128x128xf32>
    %45 = vector.shape_cast %44 : vector<1x128x128xf32> to vector<128x128xf32>
    %cst_22 = arith.constant dense<0.000000e+00> : vector<32x128xf32>
    %46 = tpu.matmul %43, %45, %cst_22 {dimension_numbers = #tpu.dot_dimension_numbers<[1], [0], [0], [1], [0, 0, 1, 1], [], []>} : vector<32x128xf32>, vector<128x128xf32>, vector<32x128xf32> -> vector<32x128xf32>
    %47 = vector.shape_cast %46 : vector<32x128xf32> to vector<4x8x128xf32>
    %cst_23 = arith.constant dense<0.000000e+00> : vector<4x128xf32>
    %48 = vector.multi_reduction <add>, %47, %cst_23 [1] : vector<4x8x128xf32> to vector<4x128xf32>
    %49 = vector.shape_cast %48 : vector<4x128xf32> to vector<4x1x128xf32>
    %cst_24 = arith.constant 1.250000e-01 : f32
    %50 = vector.broadcast %cst_24 : f32 to vector<4x1x128xf32>
    %51 = arith.mulf %49, %50 : vector<4x1x128xf32>
    %52 = arith.mulf %47, %47 : vector<4x8x128xf32>
    %cst_25 = arith.constant dense<0.000000e+00> : vector<4x128xf32>
    %53 = vector.multi_reduction <add>, %52, %cst_25 [1] : vector<4x8x128xf32> to vector<4x128xf32>
    %54 = vector.shape_cast %53 : vector<4x128xf32> to vector<4x1x128xf32>
    %cst_26 = arith.constant 1.250000e-01 : f32
    %55 = vector.broadcast %cst_26 : f32 to vector<4x1x128xf32>
    %56 = arith.mulf %54, %55 : vector<4x1x128xf32>
    %57 = arith.mulf %51, %51 : vector<4x1x128xf32>
    %58 = arith.subf %56, %57 : vector<4x1x128xf32>
    %cst_27 = arith.constant 0.000000e+00 : f32
    %59 = vector.broadcast %cst_27 : f32 to vector<4x1x128xf32>
    %60 = arith.maximumf %58, %59 : vector<4x1x128xf32>
    %c0_28 = arith.constant 0 : index
    %c0_29 = arith.constant 0 : index
    %c0_30 = arith.constant 0 : index
    %61 = vector.load %arg6[%c0_28, %c0_29, %c0_30] : memref<1x1x128xf32, #tpu.memory_space<vmem>>, vector<1x1x128xf32>
    %62 = vector.shape_cast %61 : vector<1x1x128xf32> to vector<1x128xf32>
    %63 = vector.shape_cast %62 : vector<1x128xf32> to vector<1x1x128xf32>
    %cst_31 = arith.constant 9.99999974E-6 : f32
    %64 = vector.broadcast %cst_31 : f32 to vector<4x1x128xf32>
    %65 = arith.addf %60, %64 : vector<4x1x128xf32>
    %66 = math.rsqrt %65 : vector<4x1x128xf32>
    %67 = vector.broadcast %63 : vector<1x1x128xf32> to vector<4x1x128xf32>
    %68 = arith.mulf %67, %66 : vector<4x1x128xf32>
    %c0_32 = arith.constant 0 : index
    %c0_33 = arith.constant 0 : index
    %c0_34 = arith.constant 0 : index
    %69 = vector.load %arg7[%c0_32, %c0_33, %c0_34] : memref<1x1x128xf32, #tpu.memory_space<vmem>>, vector<1x1x128xf32>
    %70 = vector.shape_cast %69 : vector<1x1x128xf32> to vector<1x128xf32>
    %71 = vector.shape_cast %70 : vector<1x128xf32> to vector<1x1x128xf32>
    %72 = arith.mulf %51, %68 : vector<4x1x128xf32>
    %73 = vector.broadcast %71 : vector<1x1x128xf32> to vector<4x1x128xf32>
    %74 = arith.subf %73, %72 : vector<4x1x128xf32>
    %75 = vector.broadcast %68 : vector<4x1x128xf32> to vector<4x8x128xf32>
    %76 = arith.mulf %47, %75 : vector<4x8x128xf32>
    %77 = vector.broadcast %74 : vector<4x1x128xf32> to vector<4x8x128xf32>
    %78 = arith.addf %76, %77 : vector<4x8x128xf32>
    %79 = arith.negf %78 : vector<4x8x128xf32>
    %80 = math.exp %79 : vector<4x8x128xf32>
    %cst_35 = arith.constant 1.000000e+00 : f32
    %81 = vector.broadcast %cst_35 : f32 to vector<4x8x128xf32>
    %82 = arith.addf %81, %80 : vector<4x8x128xf32>
    %83 = arith.divf %81, %82 : vector<4x8x128xf32>
    %c0_36 = arith.constant 0 : index
    %c0_37 = arith.constant 0 : index
    %c0_38 = arith.constant 0 : index
    %c0_39 = arith.constant 0 : index
    %84 = vector.load %arg8[%c0_36, %c0_37, %c0_38, %c0_39] : memref<1x4x8x128xf32, #tpu.memory_space<vmem>>, vector<1x4x8x128xf32>
    %85 = vector.shape_cast %84 : vector<1x4x8x128xf32> to vector<4x8x128xf32>
    %86 = vector.shape_cast %83 : vector<4x8x128xf32> to vector<1x4x8x128xf32>
    tpu.vector_store %arg8[%c0_36, %c0_37, %c0_38, %c0_39], %86 {strides = array<i32>} : memref<1x4x8x128xf32, #tpu.memory_space<vmem>>, vector<1x4x8x128xf32>,
    return
  }
  func.func @transform_0(%arg0: i32) -> (i32, i32, i32, i32) {
    %c0_i32 = arith.constant 0 : i32
    %c0_i32_0 = arith.constant 0 : i32
    %c0_i32_1 = arith.constant 0 : i32
    %c0_i32_2 = arith.constant 0 : i32
    return %arg0, %c0_i32, %c0_i32_0, %c0_i32_1 : i32, i32, i32, i32
  }
  func.func @transform_1(%arg0: i32) -> (i32, i32, i32) {
    %c0_i32 = arith.constant 0 : i32
    %c0_i32_0 = arith.constant 0 : i32
    %c0_i32_1 = arith.constant 0 : i32
    return %arg0, %c0_i32, %c0_i32_0 : i32, i32, i32
  }
  func.func @transform_2(%arg0: i32) -> (i32, i32, i32) {
    %c0_i32 = arith.constant 0 : i32
    %c0_i32_0 = arith.constant 0 : i32
    %c0_i32_1 = arith.constant 0 : i32
    return %arg0, %c0_i32, %c0_i32_0 : i32, i32, i32
  }
  func.func @transform_3(%arg0: i32) -> (i32, i32, i32) {
    %c0_i32 = arith.constant 0 : i32
    %c0_i32_0 = arith.constant 0 : i32
    %c0_i32_1 = arith.constant 0 : i32
    return %arg0, %c0_i32, %c0_i32_0 : i32, i32, i32
  }
  func.func @transform_4(%arg0: i32) -> (i32, i32, i32) {
    %c0_i32 = arith.constant 0 : i32
    %c0_i32_0 = arith.constant 0 : i32
    %c0_i32_1 = arith.constant 0 : i32
    return %arg0, %c0_i32, %c0_i32_0 : i32, i32, i32
  }
  func.func @transform_5(%arg0: i32) -> (i32, i32, i32) {
    %c0_i32 = arith.constant 0 : i32
    %c0_i32_0 = arith.constant 0 : i32
    %c0_i32_1 = arith.constant 0 : i32
    return %arg0, %c0_i32, %c0_i32_0 : i32, i32, i32
  }
  func.func @transform_6(%arg0: i32) -> (i32, i32, i32) {
    %c0_i32 = arith.constant 0 : i32
    %c0_i32_0 = arith.constant 0 : i32
    %c0_i32_1 = arith.constant 0 : i32
    return %arg0, %c0_i32, %c0_i32_0 : i32, i32, i32
  }
  func.func @transform_7(%arg0: i32) -> (i32, i32, i32, i32) {
    %c0_i32 = arith.constant 0 : i32
    %c0_i32_0 = arith.constant 0 : i32
    %c0_i32_1 = arith.constant 0 : i32
    %c0_i32_2 = arith.constant 0 : i32
    return %arg0, %c0_i32, %c0_i32_0, %c0_i32_1 : i32, i32, i32, i32
  }
}

module attributes {stable_mosaic.version = 11 : i64} {
  func.func @net_kernel(%arg0: i32, %arg1: memref<1x3x8x512xf32, #tpu.memory_space<vmem>>, %arg2: memref<1x512x128xf32, #tpu.memory_space<vmem>>, %arg3: memref<1x1x128xf32, #tpu.memory_space<vmem>>, %arg4: memref<1x1x128xf32, #tpu.memory_space<vmem>>, %arg5: memref<1x128x128xf32, #tpu.memory_space<vmem>>, %arg6: memref<1x1x128xf32, #tpu.memory_space<vmem>>, %arg7: memref<1x1x128xf32, #tpu.memory_space<vmem>>, %arg8: memref<1x3x8x128xf32, #tpu.memory_space<vmem>>) attributes {dimension_semantics = [#tpu.dimension_semantics<parallel>], iteration_bounds = array<i64: 3>, scalar_prefetch = 0 : i64, scratch_operands = 0 : i64, tpu.core_type = #tpu.core_type<tc>, window_params = [{transform_indices = @transform_0, window_bounds = array<i64: 1, 3, 8, 512>}, {transform_indices = @transform_1, window_bounds = array<i64: 1, 512, 128>}, {transform_indices = @transform_2, window_bounds = array<i64: 1, 1, 128>}, {transform_indices = @transform_3, window_bounds = array<i64: 1, 1, 128>}, {transform_indices = @transform_4, window_bounds = array<i64: 1, 128, 128>}, {transform_indices = @transform_5, window_bounds = array<i64: 1, 1, 128>}, {transform_indices = @transform_6, window_bounds = array<i64: 1, 1, 128>}, {transform_indices = @transform_7, window_bounds = array<i64: 1, 3, 8, 128>}]} {
    %c0 = arith.constant 0 : index
    %c0_0 = arith.constant 0 : index
    %c0_1 = arith.constant 0 : index
    %c0_2 = arith.constant 0 : index
    %0 = vector.load %arg1[%c0, %c0_0, %c0_1, %c0_2] : memref<1x3x8x512xf32, #tpu.memory_space<vmem>>, vector<1x3x8x512xf32>
    %1 = vector.shape_cast %0 : vector<1x3x8x512xf32> to vector<3x8x512xf32>
    %2 = vector.shape_cast %1 : vector<3x8x512xf32> to vector<24x512xf32>
    %c0_3 = arith.constant 0 : index
    %c0_4 = arith.constant 0 : index
    %c0_5 = arith.constant 0 : index
    %3 = vector.load %arg2[%c0_3, %c0_4, %c0_5] : memref<1x512x128xf32, #tpu.memory_space<vmem>>, vector<1x512x128xf32>
    %4 = vector.shape_cast %3 : vector<1x512x128xf32> to vector<512x128xf32>
    %cst = arith.constant dense<0.000000e+00> : vector<24x128xf32>
    %5 = tpu.matmul %2, %4, %cst {dimension_numbers = #tpu.dot_dimension_numbers<[1], [0], [0], [1], [0, 0, 1, 1], [], []>} : vector<24x512xf32>, vector<512x128xf32>, vector<24x128xf32> -> vector<24x128xf32>
    %6 = vector.shape_cast %5 : vector<24x128xf32> to vector<3x8x128xf32>
    %cst_6 = arith.constant dense<0.000000e+00> : vector<3x128xf32>
    %7 = vector.multi_reduction <add>, %6, %cst_6 [1] : vector<3x8x128xf32> to vector<3x128xf32>
    %8 = vector.shape_cast %7 : vector<3x128xf32> to vector<3x1x128xf32>
    %cst_7 = arith.constant 1.250000e-01 : f32
    %9 = vector.broadcast %cst_7 : f32 to vector<3x1x128xf32>
    %10 = arith.mulf %8, %9 : vector<3x1x128xf32>
    %11 = arith.mulf %6, %6 : vector<3x8x128xf32>
    %cst_8 = arith.constant dense<0.000000e+00> : vector<3x128xf32>
    %12 = vector.multi_reduction <add>, %11, %cst_8 [1] : vector<3x8x128xf32> to vector<3x128xf32>
    %13 = vector.shape_cast %12 : vector<3x128xf32> to vector<3x1x128xf32>
    %cst_9 = arith.constant 1.250000e-01 : f32
    %14 = vector.broadcast %cst_9 : f32 to vector<3x1x128xf32>
    %15 = arith.mulf %13, %14 : vector<3x1x128xf32>
    %16 = arith.mulf %10, %10 : vector<3x1x128xf32>
    %17 = arith.subf %15, %16 : vector<3x1x128xf32>
    %cst_10 = arith.constant 0.000000e+00 : f32
    %18 = vector.broadcast %cst_10 : f32 to vector<3x1x128xf32>
    %19 = arith.maximumf %17, %18 : vector<3x1x128xf32>
    %c0_11 = arith.constant 0 : index
    %c0_12 = arith.constant 0 : index
    %c0_13 = arith.constant 0 : index
    %20 = vector.load %arg3[%c0_11, %c0_12, %c0_13] : memref<1x1x128xf32, #tpu.memory_space<vmem>>, vector<1x1x128xf32>
    %21 = vector.shape_cast %20 : vector<1x1x128xf32> to vector<1x128xf32>
    %22 = vector.shape_cast %21 : vector<1x128xf32> to vector<1x1x128xf32>
    %cst_14 = arith.constant 9.99999974E-6 : f32
    %23 = vector.broadcast %cst_14 : f32 to vector<3x1x128xf32>
    %24 = arith.addf %19, %23 : vector<3x1x128xf32>
    %25 = math.rsqrt %24 : vector<3x1x128xf32>
    %26 = vector.broadcast %22 : vector<1x1x128xf32> to vector<3x1x128xf32>
    %27 = arith.mulf %26, %25 : vector<3x1x128xf32>
    %c0_15 = arith.constant 0 : index
    %c0_16 = arith.constant 0 : index
    %c0_17 = arith.constant 0 : index
    %28 = vector.load %arg4[%c0_15, %c0_16, %c0_17] : memref<1x1x128xf32, #tpu.memory_space<vmem>>, vector<1x1x128xf32>
    %29 = vector.shape_cast %28 : vector<1x1x128xf32> to vector<1x128xf32>
    %30 = vector.shape_cast %29 : vector<1x128xf32> to vector<1x1x128xf32>
    %31 = arith.mulf %10, %27 : vector<3x1x128xf32>
    %32 = vector.broadcast %30 : vector<1x1x128xf32> to vector<3x1x128xf32>
    %33 = arith.subf %32, %31 : vector<3x1x128xf32>
    %34 = vector.broadcast %27 : vector<3x1x128xf32> to vector<3x8x128xf32>
    %35 = arith.mulf %6, %34 : vector<3x8x128xf32>
    %36 = vector.broadcast %33 : vector<3x1x128xf32> to vector<3x8x128xf32>
    %37 = arith.addf %35, %36 : vector<3x8x128xf32>
    %38 = arith.negf %37 : vector<3x8x128xf32>
    %39 = math.exp %38 : vector<3x8x128xf32>
    %cst_18 = arith.constant 1.000000e+00 : f32
    %40 = vector.broadcast %cst_18 : f32 to vector<3x8x128xf32>
    %41 = arith.addf %40, %39 : vector<3x8x128xf32>
    %42 = arith.divf %40, %41 : vector<3x8x128xf32>
    %43 = vector.shape_cast %42 : vector<3x8x128xf32> to vector<24x128xf32>
    %c0_19 = arith.constant 0 : index
    %c0_20 = arith.constant 0 : index
    %c0_21 = arith.constant 0 : index
    %44 = vector.load %arg5[%c0_19, %c0_20, %c0_21] : memref<1x128x128xf32, #tpu.memory_space<vmem>>, vector<1x128x128xf32>
    %45 = vector.shape_cast %44 : vector<1x128x128xf32> to vector<128x128xf32>
    %cst_22 = arith.constant dense<0.000000e+00> : vector<24x128xf32>
    %46 = tpu.matmul %43, %45, %cst_22 {dimension_numbers = #tpu.dot_dimension_numbers<[1], [0], [0], [1], [0, 0, 1, 1], [], []>} : vector<24x128xf32>, vector<128x128xf32>, vector<24x128xf32> -> vector<24x128xf32>
    %47 = vector.shape_cast %46 : vector<24x128xf32> to vector<3x8x128xf32>
    %cst_23 = arith.constant dense<0.000000e+00> : vector<3x128xf32>
    %48 = vector.multi_reduction <add>, %47, %cst_23 [1] : vector<3x8x128xf32> to vector<3x128xf32>
    %49 = vector.shape_cast %48 : vector<3x128xf32> to vector<3x1x128xf32>
    %cst_24 = arith.constant 1.250000e-01 : f32
    %50 = vector.broadcast %cst_24 : f32 to vector<3x1x128xf32>
    %51 = arith.mulf %49, %50 : vector<3x1x128xf32>
    %52 = arith.mulf %47, %47 : vector<3x8x128xf32>
    %cst_25 = arith.constant dense<0.000000e+00> : vector<3x128xf32>
    %53 = vector.multi_reduction <add>, %52, %cst_25 [1] : vector<3x8x128xf32> to vector<3x128xf32>
    %54 = vector.shape_cast %53 : vector<3x128xf32> to vector<3x1x128xf32>
    %cst_26 = arith.constant 1.250000e-01 : f32
    %55 = vector.broadcast %cst_26 : f32 to vector<3x1x128xf32>
    %56 = arith.mulf %54, %55 : vector<3x1x128xf32>
    %57 = arith.mulf %51, %51 : vector<3x1x128xf32>
    %58 = arith.subf %56, %57 : vector<3x1x128xf32>
    %cst_27 = arith.constant 0.000000e+00 : f32
    %59 = vector.broadcast %cst_27 : f32 to vector<3x1x128xf32>
    %60 = arith.maximumf %58, %59 : vector<3x1x128xf32>
    %c0_28 = arith.constant 0 : index
    %c0_29 = arith.constant 0 : index
    %c0_30 = arith.constant 0 : index
    %61 = vector.load %arg6[%c0_28, %c0_29, %c0_30] : memref<1x1x128xf32, #tpu.memory_space<vmem>>, vector<1x1x128xf32>
    %62 = vector.shape_cast %61 : vector<1x1x128xf32> to vector<1x128xf32>
    %63 = vector.shape_cast %62 : vector<1x128xf32> to vector<1x1x128xf32>
    %cst_31 = arith.constant 9.99999974E-6 : f32
    %64 = vector.broadcast %cst_31 : f32 to vector<3x1x128xf32>
    %65 = arith.addf %60, %64 : vector<3x1x128xf32>
    %66 = math.rsqrt %65 : vector<3x1x128xf32>
    %67 = vector.broadcast %63 : vector<1x1x128xf32> to vector<3x1x128xf32>
    %68 = arith.mulf %67, %66 : vector<3x1x128xf32>
    %c0_32 = arith.constant 0 : index
    %c0_33 = arith.constant 0 : index
    %c0_34 = arith.constant 0 : index
    %69 = vector.load %arg7[%c0_32, %c0_33, %c0_34] : memref<1x1x128xf32, #tpu.memory_space<vmem>>, vector<1x1x128xf32>
    %70 = vector.shape_cast %69 : vector<1x1x128xf32> to vector<1x128xf32>
    %71 = vector.shape_cast %70 : vector<1x128xf32> to vector<1x1x128xf32>
    %72 = arith.mulf %51, %68 : vector<3x1x128xf32>
    %73 = vector.broadcast %71 : vector<1x1x128xf32> to vector<3x1x128xf32>
    %74 = arith.subf %73, %72 : vector<3x1x128xf32>
    %75 = vector.broadcast %68 : vector<3x1x128xf32> to vector<3x8x128xf32>
    %76 = arith.mulf %47, %75 : vector<3x8x128xf32>
    %77 = vector.broadcast %74 : vector<3x1x128xf32> to vector<3x8x128xf32>
    %78 = arith.addf %76, %77 : vector<3x8x128xf32>
    %79 = arith.negf %78 : vector<3x8x128xf32>
    %80 = math.exp %79 : vector<3x8x128xf32>
    %cst_35 = arith.constant 1.000000e+00 : f32
    %81 = vector.broadcast %cst_35 : f32 to vector<3x8x128xf32>
    %82 = arith.addf %81, %80 : vector<3x8x128xf32>
    %83 = arith.divf %81, %82 : vector<3x8x128xf32>
    %c0_36 = arith.constant 0 : index
    %c0_37 = arith.constant 0 : index
    %c0_38 = arith.constant 0 : index
    %c0_39 = arith.constant 0 : index
    %84 = vector.load %arg8[%c0_36, %c0_37, %c0_38, %c0_39] : memref<1x3x8x128xf32, #tpu.memory_space<vmem>>, vector<1x3x8x128xf32>
    %85 = vector.shape_cast %84 : vector<1x3x8x128xf32> to vector<3x8x128xf32>
    %86 = vector.shape_cast %83 : vector<3x8x128xf32> to vector<1x3x8x128xf32>
    tpu.vector_store %arg8[%c0_36, %c0_37, %c0_38, %c0_39], %86 {strides = array<i32>} : memref<1x3x8x128xf32, #tpu.memory_space<vmem>>, vector<1x3x8x128xf32>,
    return
  }
  func.func @transform_0(%arg0: i32) -> (i32, i32, i32, i32) {
    %c0_i32 = arith.constant 0 : i32
    %c0_i32_0 = arith.constant 0 : i32
    %c0_i32_1 = arith.constant 0 : i32
    %c0_i32_2 = arith.constant 0 : i32
    return %arg0, %c0_i32, %c0_i32_0, %c0_i32_1 : i32, i32, i32, i32
  }
  func.func @transform_1(%arg0: i32) -> (i32, i32, i32) {
    %c0_i32 = arith.constant 0 : i32
    %c0_i32_0 = arith.constant 0 : i32
    %c0_i32_1 = arith.constant 0 : i32
    return %arg0, %c0_i32, %c0_i32_0 : i32, i32, i32
  }
  func.func @transform_2(%arg0: i32) -> (i32, i32, i32) {
    %c0_i32 = arith.constant 0 : i32
    %c0_i32_0 = arith.constant 0 : i32
    %c0_i32_1 = arith.constant 0 : i32
    return %arg0, %c0_i32, %c0_i32_0 : i32, i32, i32
  }
  func.func @transform_3(%arg0: i32) -> (i32, i32, i32) {
    %c0_i32 = arith.constant 0 : i32
    %c0_i32_0 = arith.constant 0 : i32
    %c0_i32_1 = arith.constant 0 : i32
    return %arg0, %c0_i32, %c0_i32_0 : i32, i32, i32
  }
  func.func @transform_4(%arg0: i32) -> (i32, i32, i32) {
    %c0_i32 = arith.constant 0 : i32
    %c0_i32_0 = arith.constant 0 : i32
    %c0_i32_1 = arith.constant 0 : i32
    return %arg0, %c0_i32, %c0_i32_0 : i32, i32, i32
  }
  func.func @transform_5(%arg0: i32) -> (i32, i32, i32) {
    %c0_i32 = arith.constant 0 : i32
    %c0_i32_0 = arith.constant 0 : i32
    %c0_i32_1 = arith.constant 0 : i32
    return %arg0, %c0_i32, %c0_i32_0 : i32, i32, i32
  }
  func.func @transform_6(%arg0: i32) -> (i32, i32, i32) {
    %c0_i32 = arith.constant 0 : i32
    %c0_i32_0 = arith.constant 0 : i32
    %c0_i32_1 = arith.constant 0 : i32
    return %arg0, %c0_i32, %c0_i32_0 : i32, i32, i32
  }
  func.func @transform_7(%arg0: i32) -> (i32, i32, i32, i32) {
    %c0_i32 = arith.constant 0 : i32
    %c0_i32_0 = arith.constant 0 : i32
    %c0_i32_1 = arith.constant 0 : i32
    %c0_i32_2 = arith.constant 0 : i32
    return %arg0, %c0_i32, %c0_i32_0, %c0_i32_1 : i32, i32, i32, i32
  }
}

</mosaic_0001>

<bundles_post_ra>
// kernel: _graph_layer_forward.3
= control target key start
LH: loop header
LB: loop body
LE: loop exit
PB: predicated region body
PF: predicated region fallthrough
CT: control target
= control target key end

     0   :  { %s1380_s24 = smov 0   ;;  %s1617_s0 = inlined_call_operand.vmem [shape: f32[3,3,8,512], index: 0, kind: input, shape index: {}]   ;;  %s1618_s1 = inlined_call_operand.vmem [shape: f32[3,512,128], index: 1, kind: input, shape index: {}]   ;;  %s1619_s2 = inlined_call_operand.vmem [shape: f32[3,1,128], index: 2, kind: input, shape index: {}]   ;;  %s1620_s3 = inlined_call_operand.vmem [shape: f32[3,1,128], index: 3, kind: input, shape index: {}]   ;;  %s1621_s4 = inlined_call_operand.vmem [shape: f32[3,128,128], index: 4, kind: input, shape index: {}]   ;;  %s1622_s5 = inlined_call_operand.vmem [shape: f32[3,1,128], index: 5, kind: input, shape index: {}]   ;;  %s1623_s6 = inlined_call_operand.vmem [shape: f32[3,1,128], index: 6, kind: input, shape index: {}]   ;;  %s1624_s7 = inlined_call_operand.vmem [shape: f32[3,3,8,128], index: 7, kind: output, shape index: {}]  }
   0x1 LB: > { %s1087_s25 = sadd.s32 4294967295, %s1336_s24   ;;  %p1091_p0 = scmp.ge.s32.totalorder %s1336_s24, 1  ;;  %s1336_s24 = sphi %s1380_s24, %s17_s24  }
   0x2   : > { %p289_p1 = scmp.lt.s32.totalorder %s1336_s24, 4 }
   0x4   : > { %p290_p2 = pnand %p1091_p0, %p289_p1 }
   0x5   : > { %p343_p3 = scmp.lt.s32.totalorder (!%p290_p2), %s1087_s25, 2 }
   0x6   : > { %293 = sbr.rel (%p290_p2) target bundleno = 608 (0x260), region = 48 }
   0xb   : > { %s1626_s25 = smov (!%p343_p3, %s1087_s25), 2  ;;  %vm1339_vm0 = vmmov 0  }
   0xc   : > { %s1106_s26 = sshll.u32 %s1626_s25, 9  ;;  %s1282_s30 = smul.u32 96, %s1626_s25 }
   0xd   : > { %s1394_s29 = scalar_lea.vmem %s1618_s1, %s1106_s26  ;;  %s1107_s11 = sshll.u32 %s1626_s25, 7 }
   0xe   : > { %v418_v0 = vld [vmem:[%s1394_s29 + $0xf8] sm:$0xff]  ;;  %v417_v4 = vld [vmem:[%s1394_s29 + $0xf0] sm:$0xff]  ;;  %v416_v8 = vld [vmem:[%s1394_s29 + $0xe8] sm:$0xff]  ;;  %s1458_s10 = scalar_lea.vmem %s1617_s0, %s1282_s30  ;;  %s1482_s14 = scalar_lea.vmem %s1621_s4, %s1107_s11 }
   0xf   : > { %v450_v1 = vld [vmem:[%s1394_s29 + $0x1f8] sm:$0xff]  ;;  %1108 = vmatprep.subr.mxu0 %v418_v0  ;;  %v449_v5 = vld [vmem:[%s1394_s29 + $0x1f0] sm:$0xff]  ;;  %v448_v9 = vld [vmem:[%s1394_s29 + $0x1e8] sm:$0xff]  ;;  %s355_s17 = scalar_lea.vmem %s1619_s2, %s1626_s25  ;;  %s358_s20 = scalar_lea.vmem %s1620_s3, %s1626_s25 }
  0x10   : > { %v402_v2 = vld [vmem:[%s1394_s29 + $0x78] sm:$0xff]  ;;  %1149 = vmatprep.subr.mxu1 %v450_v1  ;;  %v401_v6 = vld [vmem:[%s1394_s29 + $0x70] sm:$0xff]  ;;  %v400_v10 = vld [vmem:[%s1394_s29 + $0x68] sm:$0xff]  ;;  %s366_s23 = scalar_lea.vmem %s1622_s5, %s1626_s25  ;;  %s369_s28 = scalar_lea.vmem %s1623_s6, %s1626_s25 }
  0x11   : > { %v434_v3 = vld [vmem:[%s1394_s29 + $0x178] sm:$0xff]  ;;  %1109 = vmatpush3.msra.mxu0 %v402_v2  ;;  %v433_v7 = vld [vmem:[%s1394_s29 + $0x170] sm:$0xff]  ;;  %v432_v11 = vld [vmem:[%s1394_s29 + $0x168] sm:$0xff] }
  0x12   : > { %1150 = vmatpush3.msra.mxu1 %v434_v3  ;;  %1110 = vmatprep.subr.mxu0 %v417_v4  ;;  %v415_v12 = vld [vmem:[%s1394_s29 + $0xe0] sm:$0xff]  ;;  %v414_v16 = vld [vmem:[%s1394_s29 + $0xd8] sm:$0xff]  ;;  %v413_v20 = vld [vmem:[%s1394_s29 + $0xd0] sm:$0xff] }
  0x13   : > { %1151 = vmatprep.subr.mxu1 %v449_v5  ;;  %1111 = vmatpush3.msra.mxu0 %v401_v6  ;;  %v447_v13 = vld [vmem:[%s1394_s29 + $0x1e0] sm:$0xff]  ;;  %v446_v17 = vld [vmem:[%s1394_s29 + $0x1d8] sm:$0xff]  ;;  %v445_v21 = vld [vmem:[%s1394_s29 + $0x1d0] sm:$0xff] }
  0x14   : > { %1152 = vmatpush3.msra.mxu1 %v433_v7  ;;  %1112 = vmatprep.subr.mxu0 %v416_v8  ;;  %v399_v14 = vld [vmem:[%s1394_s29 + $0x60] sm:$0xff]  ;;  %v398_v18 = vld [vmem:[%s1394_s29 + $0x58] sm:$0xff]  ;;  %v397_v22 = vld [vmem:[%s1394_s29 + $0x50] sm:$0xff] }
  0x15   : > { %1153 = vmatprep.subr.mxu1 %v448_v9  ;;  %v431_v15 = vld [vmem:[%s1394_s29 + $0x160] sm:$0xff]  ;;  %1113 = vmatpush3.msra.mxu0 %v400_v10  ;;  %v430_v19 = vld [vmem:[%s1394_s29 + $0x158] sm:$0xff]  ;;  %v429_v23 = vld [vmem:[%s1394_s29 + $0x150] sm:$0xff] }
  0x16   : > { %1154 = vmatpush3.msra.mxu1 %v432_v11  ;;  %1114 = vmatprep.subr.mxu0 %v415_v12  ;;  %v412_v24 = vld [vmem:[%s1394_s29 + $0xc8] sm:$0xff]  ;;  %v411_v28 = vld [vmem:[%s1394_s29 + $0xc0] sm:$0xff]  ;;  %v410_v32 = vld [vmem:[%s1394_s29 + $0xb8] sm:$0xff]  ;;  %v1338_v12 = vmov 0.0  }
  0x17   : > { %1155 = vmatprep.subr.mxu1 %v447_v13  ;;  %1115 = vmatpush3.msra.mxu0 %v399_v14  ;;  %v444_v25 = vld [vmem:[%s1394_s29 + $0x1c8] sm:$0xff]  ;;  %v443_v29 = vld [vmem:[%s1394_s29 + $0x1c0] sm:$0xff]  ;;  %v442_v33 = vld [vmem:[%s1394_s29 + $0x1b8] sm:$0xff] }
  0x18   : > { %1156 = vmatpush3.msra.mxu1 %v431_v15  ;;  %1116 = vmatprep.subr.mxu0 %v414_v16  ;;  %v396_v26 = vld [vmem:[%s1394_s29 + $0x48] sm:$0xff]  ;;  %v395_v30 = vld [vmem:[%s1394_s29 + $0x40] sm:$0xff]  ;;  %v394_v34 = vld [vmem:[%s1394_s29 + $0x38] sm:$0xff] }
  0x19   : > { %1157 = vmatprep.subr.mxu1 %v446_v17  ;;  %1117 = vmatpush3.msra.mxu0 %v398_v18  ;;  %v428_v27 = vld [vmem:[%s1394_s29 + $0x148] sm:$0xff]  ;;  %v427_v31 = vld [vmem:[%s1394_s29 + $0x140] sm:$0xff]  ;;  %v426_v35 = vld [vmem:[%s1394_s29 + $0x138] sm:$0xff] }
  0x1a   : > { %1158 = vmatpush3.msra.mxu1 %v430_v19  ;;  %1118 = vmatprep.subr.mxu0 %v413_v20  ;;  %v409_v36 = vld [vmem:[%s1394_s29 + $0xb0] sm:$0xff]  ;;  %v408_v40 = vld [vmem:[%s1394_s29 + $0xa8] sm:$0xff]  ;;  %v407_v44 = vld [vmem:[%s1394_s29 + $0xa0] sm:$0xff] }
  0x1b   : > { %1159 = vmatprep.subr.mxu1 %v445_v21  ;;  %1119 = vmatpush3.msra.mxu0 %v397_v22  ;;  %v441_v37 = vld [vmem:[%s1394_s29 + $0x1b0] sm:$0xff]  ;;  %v440_v41 = vld [vmem:[%s1394_s29 + $0x1a8] sm:$0xff]  ;;  %v439_v45 = vld [vmem:[%s1394_s29 + $0x1a0] sm:$0xff] }
  0x1c   : > { %1160 = vmatpush3.msra.mxu1 %v429_v23  ;;  %1120 = vmatprep.subr.mxu0 %v412_v24  ;;  %v393_v38 = vld [vmem:[%s1394_s29 + $0x30] sm:$0xff]  ;;  %v392_v42 = vld [vmem:[%s1394_s29 + $0x28] sm:$0xff]  ;;  %v391_v46 = vld [vmem:[%s1394_s29 + $0x20] sm:$0xff] }
  0x1d   : > { %1161 = vmatprep.subr.mxu1 %v444_v25  ;;  %1121 = vmatpush3.msra.mxu0 %v396_v26  ;;  %v425_v39 = vld [vmem:[%s1394_s29 + $0x130] sm:$0xff]  ;;  %v424_v43 = vld [vmem:[%s1394_s29 + $0x128] sm:$0xff]  ;;  %v423_v47 = vld [vmem:[%s1394_s29 + $0x120] sm:$0xff] }
  0x1e   : > { %1162 = vmatpush3.msra.mxu1 %v428_v27  ;;  %1122 = vmatprep.subr.mxu0 %v411_v28  ;;  %v406_v48 = vld [vmem:[%s1394_s29 + $0x98] sm:$0xff]  ;;  %v405_v52 = vld [vmem:[%s1394_s29 + $0x90] sm:$0xff]  ;;  %v404_v56 = vld [vmem:[%s1394_s29 + $0x88] sm:$0xff] }
  0x1f   : > { %1163 = vmatprep.subr.mxu1 %v443_v29  ;;  %1123 = vmatpush3.msra.mxu0 %v395_v30  ;;  %v438_v49 = vld [vmem:[%s1394_s29 + $0x198] sm:$0xff]  ;;  %v437_v53 = vld [vmem:[%s1394_s29 + $0x190] sm:$0xff]  ;;  %v436_v57 = vld [vmem:[%s1394_s29 + $0x188] sm:$0xff] }
  0x20   : > { %1164 = vmatpush3.msra.mxu1 %v427_v31  ;;  %1124 = vmatprep.subr.mxu0 %v410_v32  ;;  %v390_v50 = vld [vmem:[%s1394_s29 + $0x18] sm:$0xff]  ;;  %v389_v54 = vld [vmem:[%s1394_s29 + $0x10] sm:$0xff]  ;;  %v388_v58 = vld [vmem:[%s1394_s29 + $0x8] sm:$0xff] }
  0x21   : > { %1165 = vmatprep.subr.mxu1 %v442_v33  ;;  %1125 = vmatpush3.msra.mxu0 %v394_v34  ;;  %v422_v51 = vld [vmem:[%s1394_s29 + $0x118] sm:$0xff]  ;;  %v421_v55 = vld [vmem:[%s1394_s29 + $0x110] sm:$0xff]  ;;  %v420_v59 = vld [vmem:[%s1394_s29 + $0x108] sm:$0xff] }
  0x22   : > { %1166 = vmatpush3.msra.mxu1 %v426_v35  ;;  %1126 = vmatprep.subr.mxu0 %v409_v36  ;;  %v403_v60 = vld [vmem:[%s1394_s29 + $0x80] sm:$0xff]  ;;  %v376_v63 = vld [vmem:[%s1458_s10 + $0x8] sm:$0xff]  ;;  %v378_v1 = vld [vmem:[%s1458_s10 + $0x18] sm:$0xff] }
  0x23   : > { %1167 = vmatprep.subr.mxu1 %v441_v37  ;;  %1127 = vmatpush3.msra.mxu0 %v393_v38  ;;  %v435_v61 = vld [vmem:[%s1394_s29 + $0x180] sm:$0xff]  ;;  %v377_v3 = vld [vmem:[%s1458_s10 + $0x10] sm:$0xff]  ;;  %v380_v4 = vld [vmem:[%s1458_s10 + $0x28] sm:$0xff] }
  0x24   : > { %1168 = vmatpush3.msra.mxu1 %v425_v39  ;;  %1128 = vmatprep.subr.mxu0 %v408_v40  ;;  %v387_v62 = vld [vmem:[%s1394_s29] sm:$0xff]  ;;  %v382_v5 = vld [vmem:[%s1458_s10 + $0x38] sm:$0xff]  ;;  %v381_v7 = vld [vmem:[%s1458_s10 + $0x30] sm:$0xff] }
  0x25   : > { %1169 = vmatprep.subr.mxu1 %v440_v41  ;;  %1129 = vmatpush3.msra.mxu0 %v392_v42  ;;  %v419_v0 = vld [vmem:[%s1394_s29 + $0x100] sm:$0xff]  ;;  %v384_v8 = vld [vmem:[%s1458_s10 + $0x48] sm:$0xff]  ;;  %v386_v9 = vld [vmem:[%s1458_s10 + $0x58] sm:$0xff]  ;;  %s1283_s29 = smul.u32 24, %s1626_s25 }
  0x26   : > { %1170 = vmatpush3.msra.mxu1 %v424_v43  ;;  %1130 = vmatprep.subr.mxu0 %v407_v44  ;;  %v375_v2 = vld [vmem:[%s1458_s10] sm:$0xff]  ;;  %v385_v11 = vld [vmem:[%s1458_s10 + $0x50] sm:$0xff]  ;;  %v757_v13 = vld [vmem:[%s1482_s14 + $0x78] sm:$0xff] }
  0x27   : > { %1171 = vmatprep.subr.mxu1 %v439_v45  ;;  %1131 = vmatpush3.msra.mxu0 %v391_v46  ;;  %v379_v6 = vld [vmem:[%s1458_s10 + $0x20] sm:$0xff]  ;;  %v756_v14 = vld [vmem:[%s1482_s14 + $0x70] sm:$0xff]  ;;  %v755_v15 = vld [vmem:[%s1482_s14 + $0x68] sm:$0xff]  ;;  %s374_s9 = scalar_lea.vmem %s1624_s7, %s1283_s29 }
  0x28   : > { %1172 = vmatpush3.msra.mxu1 %v423_v47  ;;  %1132 = vmatprep.subr.mxu0 %v406_v48  ;;  %v383_v10 = vld [vmem:[%s1458_s10 + $0x40] sm:$0xff]  ;;  %v753_v17 = vld [vmem:[%s1482_s14 + $0x58] sm:$0xff]  ;;  %v752_v18 = vld [vmem:[%s1482_s14 + $0x50] sm:$0xff] }
  0x29   : > { %1173 = vmatprep.subr.mxu1 %v438_v49  ;;  %1133 = vmatpush3.msra.mxu0 %v390_v50  ;;  %v754_v16 = vld [vmem:[%s1482_s14 + $0x60] sm:$0xff]  ;;  %v751_v19 = vld [vmem:[%s1482_s14 + $0x48] sm:$0xff]  ;;  %v749_v21 = vld [vmem:[%s1482_s14 + $0x38] sm:$0xff] }
  0x2a   : > { %1174 = vmatpush3.msra.mxu1 %v422_v51  ;;  %1134 = vmatprep.subr.mxu0 %v405_v52  ;;  %v750_v20 = vld [vmem:[%s1482_s14 + $0x40] sm:$0xff]  ;;  %v748_v22 = vld [vmem:[%s1482_s14 + $0x30] sm:$0xff]  ;;  %v747_v23 = vld [vmem:[%s1482_s14 + $0x28] sm:$0xff] }
  0x2b   : > { %1175 = vmatprep.subr.mxu1 %v437_v53  ;;  %1135 = vmatpush3.msra.mxu0 %v389_v54  ;;  %v746_v24 = vld [vmem:[%s1482_s14 + $0x20] sm:$0xff]  ;;  %v745_v25 = vld [vmem:[%s1482_s14 + $0x18] sm:$0xff]  ;;  %v744_v26 = vld [vmem:[%s1482_s14 + $0x10] sm:$0xff] }
  0x2c   : > { %1176 = vmatpush3.msra.mxu1 %v421_v55  ;;  %1136 = vmatprep.subr.mxu0 %v404_v56  ;;  %v743_v27 = vld [vmem:[%s1482_s14 + $0x8] sm:$0xff]  ;;  %v742_v28 = vld [vmem:[%s1482_s14] sm:$0xff] }
  0x2d   : > { %1177 = vmatprep.subr.mxu1 %v436_v57  ;;  %1137 = vmatpush3.msra.mxu0 %v388_v58 }
  0x2e   : > { %1178 = vmatpush3.msra.mxu1 %v420_v59  ;;  %1138 = vmatprep.subr.mxu0 %v403_v60 }
  0x2f   : > { %1179 = vmatprep.subr.mxu1 %v435_v61  ;;  %1139 = vmatpush3.msra.mxu0 %v387_v62 }
  0x30   : > { %515 = vmatprep.mubr.f32.mxu0 %v376_v63  ;;  %1180 = vmatpush3.msra.mxu1 %v419_v0 }
  0x31   : > { %595 = vmatprep.mubr.f32.mxu1 %v378_v1  ;;  %516 = vmatmul.mubr.f32.vlgmr.msra.gmra.mxu0 %v375_v2 }
  0x32   : > { %596 = vmatmul.mubr.f32.vlgmr.msra.gmra.mxu1 %v377_v3  ;;  %520 = vmatprep.mubr.f32.mxu0 %v380_v4 }
  0x33   : > { %600 = vmatprep.mubr.f32.mxu1 %v382_v5  ;;  %1209 = vmatprep.subr.mxu0 %v1338_v12 }
  0x34   : > { %1250 = vmatprep.subr.mxu1 %v1338_v12  ;;  %1210 = vmatpush3.msra.mxu0 %v757_v13 }
  0x35   : > { %521 = vmatmul.mubr.f32.gmra.mxu0 %v379_v6  ;;  %1266 = vmatpush3.msra.mxu1 %v757_v13 }
  0x36   : > { %601 = vmatmul.mubr.f32.gmra.mxu1 %v381_v7  ;;  %525 = vmatprep.mubr.f32.mxu0 %v384_v8 }
  0x37   : > { %605 = vmatprep.mubr.f32.mxu1 %v386_v9  ;;  %1211 = vmatprep.subr.mxu0 %v1338_v12 }
  0x38   : > { %1251 = vmatprep.subr.mxu1 %v1338_v12  ;;  %1212 = vmatpush3.msra.mxu0 %v756_v14 }
  0x39   : > { %526 = vmatmul.mubr.f32.gmra.mxu0 %v383_v10  ;;  %1267 = vmatpush3.msra.mxu1 %v756_v14 }
  0x3a   : > { %606 = vmatmul.mubr.f32.gmra.mxu1 %v385_v11  ;;  %1213 = vmatprep.subr.mxu0 %v1338_v12 }
  0x3b   : > { %1252 = vmatprep.subr.mxu1 %v1338_v12  ;;  %1214 = vmatpush3.msra.mxu0 %v755_v15 }
  0x3c   : > { %1268 = vmatpush3.msra.mxu1 %v755_v15  ;;  %1215 = vmatprep.subr.mxu0 %v1338_v12 }
  0x3d   : > { %1253 = vmatprep.subr.mxu1 %v1338_v12  ;;  %1216 = vmatpush3.msra.mxu0 %v754_v16 }
  0x3e   : > { %1269 = vmatpush3.msra.mxu1 %v754_v16  ;;  %1217 = vmatprep.subr.mxu0 %v1338_v12 }
  0x3f   : > { %1254 = vmatprep.subr.mxu1 %v1338_v12  ;;  %1218 = vmatpush3.msra.mxu0 %v753_v17 }
  0x40   : > { %1270 = vmatpush3.msra.mxu1 %v753_v17  ;;  %1219 = vmatprep.subr.mxu0 %v1338_v12 }
  0x41   : > { %1255 = vmatprep.subr.mxu1 %v1338_v12  ;;  %1220 = vmatpush3.msra.mxu0 %v752_v18 }
  0x42   : > { %1271 = vmatpush3.msra.mxu1 %v752_v18  ;;  %1221 = vmatprep.subr.mxu0 %v1338_v12 }
  0x43   : > { %1256 = vmatprep.subr.mxu1 %v1338_v12  ;;  %1222 = vmatpush3.msra.mxu0 %v751_v19 }
  0x44   : > { %1272 = vmatpush3.msra.mxu1 %v751_v19  ;;  %1223 = vmatprep.subr.mxu0 %v1338_v12 }
  0x45   : > { %1257 = vmatprep.subr.mxu1 %v1338_v12  ;;  %1224 = vmatpush3.msra.mxu0 %v750_v20 }
  0x46   : > { %1273 = vmatpush3.msra.mxu1 %v750_v20  ;;  %1225 = vmatprep.subr.mxu0 %v1338_v12 }
  0x47   : > { %1258 = vmatprep.subr.mxu1 %v1338_v12  ;;  %1226 = vmatpush3.msra.mxu0 %v749_v21 }
  0x48   : > { %1274 = vmatpush3.msra.mxu1 %v749_v21  ;;  %1227 = vmatprep.subr.mxu0 %v1338_v12 }
  0x49   : > { %1259 = vmatprep.subr.mxu1 %v1338_v12  ;;  %1228 = vmatpush3.msra.mxu0 %v748_v22 }
  0x4a   : > { %1275 = vmatpush3.msra.mxu1 %v748_v22  ;;  %1229 = vmatprep.subr.mxu0 %v1338_v12 }
  0x4b   : > { %1260 = vmatprep.subr.mxu1 %v1338_v12  ;;  %1230 = vmatpush3.msra.mxu0 %v747_v23 }
  0x4c   : > { %1276 = vmatpush3.msra.mxu1 %v747_v23  ;;  %1231 = vmatprep.subr.mxu0 %v1338_v12 }
  0x4d   : > { %1261 = vmatprep.subr.mxu1 %v1338_v12  ;;  %1232 = vmatpush3.msra.mxu0 %v746_v24 }
  0x4e   : > { %1277 = vmatpush3.msra.mxu1 %v746_v24  ;;  %1233 = vmatprep.subr.mxu0 %v1338_v12 }
  0x4f   : > { %1262 = vmatprep.subr.mxu1 %v1338_v12  ;;  %1234 = vmatpush3.msra.mxu0 %v745_v25 }
  0x50   : > { %1278 = vmatpush3.msra.mxu1 %v745_v25  ;;  %1235 = vmatprep.subr.mxu0 %v1338_v12 }
  0x51   : > { %1263 = vmatprep.subr.mxu1 %v1338_v12  ;;  %1236 = vmatpush3.msra.mxu0 %v744_v26 }
  0x52   : > { %1279 = vmatpush3.msra.mxu1 %v744_v26  ;;  %1237 = vmatprep.subr.mxu0 %v1338_v12 }
  0x53   : > { %1241 = vmatprep.mubr.msk.f32.mxu0 %vm1339_vm0, %v1338_v12  ;;  %1238 = vmatpush3.msra.mxu0 %v743_v27 }
  0x54   : > { %1264 = vmatprep.subr.mxu1 %v1338_v12  ;;  %1239 = vmatprep.subr.mxu0 %v1338_v12 }
  0x55   : > { %1280 = vmatpush3.msra.mxu1 %v743_v27  ;;  %1240 = vmatpush3.msra.mxu0 %v742_v28 }
  0x56   : > { %1265 = vmatprep.subr.mxu1 %v1338_v12  ;;  %1244 = vmatprep.mubr.msk.f32.mxu1 %vm1339_vm0, %v1338_v12 }
  0x57   : > { %1281 = vmatpush3.msra.mxu1 %v742_v28 }
  0xf1   : > { %v1140_v29 = vpop.f32.mrf.mxu0 }
  0xf2   : > { %v1181_v30 = vpop.f32.mrf.mxu1 }
  0xf3   : > { %v1141_v31 = vpop.f32.mrf.mxu0 }
  0xf4   : > { %v1182_v32 = vpop.f32.mrf.mxu1  ;;  %v1142_v33 = vadd.f32 %v1141_v31, %v1140_v29 }
  0xf5   : > { %v1183_v34 = vadd.f32 %v1182_v32, %v1181_v30  ;;  %v1143_v35 = vpop.f32.mrf.mxu0 }
  0xf6   : > { %v1184_v36 = vpop.f32.mrf.mxu1 }
  0xf7   : > { %v1536_v37 = vadd.f32 %v1183_v34, %v1142_v33  ;;  %v1144_v38 = vpop.f32.mrf.mxu0 }
  0xf8   : > { %v1185_v39 = vpop.f32.mrf.mxu1  ;;  %v1145_v42 = vadd.f32 %v1144_v38, %v1143_v35 }
  0xf9   : > { %v611_v40 = vrot.slane %v1536_v37, 4  ;;  %v632_v41 = vmul.f32 %v1536_v37, %v1536_v37  ;;  %v1186_v43 = vadd.f32 %v1185_v39, %v1184_v36  ;;  %v1146_v44 = vpop.f32.mrf.mxu0 }
  0xfa   : > { %v1187_v45 = vpop.f32.mrf.mxu1 }
  0xfb   : > { %v612_v46 = vadd.f32 %v611_v40, %v1536_v37  ;;  %v635_v47 = vrot.slane %v632_v41, 4  ;;  %v1542_v48 = vadd.f32 %v1186_v43, %v1145_v42  ;;  %v1147_v49 = vpop.f32.mrf.mxu0  ;;  %v685_v43 = vlaneseq }
  0xfc   : > { %v1188_v50 = vpop.f32.mrf.mxu1  ;;  %v1148_v55 = vadd.f32 %v1147_v49, %v1146_v44 }
  0xfd   : > { %v613_v51 = vrot.slane %v612_v46, 2  ;;  %v636_v52 = vadd.f32 %v635_v47, %v632_v41  ;;  %v617_v53 = vrot.slane %v1542_v48, 4  ;;  %v633_v54 = vmul.f32 %v1542_v48, %v1542_v48  ;;  %v665_v47 = vld [vmem:[%s355_s17] sm:$0x1] }
  0xfe   : > { %v1189_v56 = vadd.f32 %v1188_v50, %v1187_v45 }
  0xff   : > { %v614_v57 = vadd.f32 %v613_v51, %v612_v46  ;;  %v637_v58 = vrot.slane %v636_v52, 2  ;;  %v618_v59 = vadd.f32 %v617_v53, %v1542_v48  ;;  %v641_v60 = vrot.slane %v633_v54, 4 }
 0x100   : > { %v1548_v61 = vadd.f32 %v1189_v56, %v1148_v55  ;;  %v686_v46 = vshrl.u32 %v685_v43, 7 }
 0x101   : > { %v615_v62 = vrot.slane %v614_v57, 1  ;;  %v638_v63 = vadd.f32 %v637_v58, %v636_v52  ;;  %v619_v0 = vrot.slane %v618_v59, 2  ;;  %v642_v1 = vadd.f32 %v641_v60, %v633_v54  ;;  %v675_v52 = vld [vmem:[%s358_s20] sm:$0x1] }
 0x102   : > { %v623_v2 = vrot.slane %v1548_v61, 4  ;;  %v634_v3 = vmul.f32 %v1548_v61, %v1548_v61  ;;  %v1562_v49 = vsub.s32 0, %v686_v46 }
 0x103   : > { %v616_v4 = vadd.f32 %v615_v62, %v614_v57  ;;  %v639_v5 = vrot.slane %v638_v63, 1  ;;  %v620_v6 = vadd.f32 %v619_v0, %v618_v59  ;;  %v643_v7 = vrot.slane %v642_v1, 2 }
 0x104   : > { %v624_v8 = vadd.f32 %v623_v2, %v1548_v61  ;;  %v647_v9 = vrot.slane %v634_v3, 4 }
 0x105   : > { %v629_v10 = vmul.f32 0.125, %v616_v4  ;;  %v640_v11 = vadd.f32 %v639_v5, %v638_v63  ;;  %v621_v13 = vrot.slane %v620_v6, 1  ;;  %v644_v14 = vadd.f32 %v643_v7, %v642_v1 }
 0x106   : > { %v625_v15 = vrot.slane %v624_v8, 2  ;;  %v648_v16 = vadd.f32 %v647_v9, %v634_v3 }
 0x107   : > { %v653_v17 = vmul.f32 0.125, %v640_v11  ;;  %v656_v18 = vmul.f32 %v629_v10, %v629_v10  ;;  %v622_v19 = vadd.f32 %v621_v13, %v620_v6  ;;  %v645_v20 = vrot.slane %v644_v14, 1 }
 0x108   : > { %v626_v21 = vadd.f32 %v625_v15, %v624_v8  ;;  %v649_v22 = vrot.slane %v648_v16, 2 }
 0x109   : > { %v659_v23 = vsub.f32 %v653_v17, %v656_v18  ;;  %v630_v24 = vmul.f32 0.125, %v622_v19  ;;  %v646_v25 = vadd.f32 %v645_v20, %v644_v14 }
 0x10a   : > { %v627_v26 = vrot.slane %v626_v21, 1  ;;  %v650_v27 = vadd.f32 %v649_v22, %v648_v16 }
 0x10b   : > { %v662_v28 = vmax.f32 %v659_v23, 0.0  ;;  %v654_v29 = vmul.f32 0.125, %v646_v25  ;;  %v657_v30 = vmul.f32 %v630_v24, %v630_v24 }
 0x10c   : > { %v628_v31 = vadd.f32 %v627_v26, %v626_v21  ;;  %v651_v32 = vrot.slane %v650_v27, 1 }
 0x10d   : > { %v666_v33 = vadd.f32 1e-05, %v662_v28  ;;  %v660_v34 = vsub.f32 %v654_v29, %v657_v30 }
 0x10e   : > { %v631_v35 = vmul.f32 0.125, %v628_v31  ;;  %v652_v36 = vadd.f32 %v651_v32, %v650_v27 }
 0x10f   : > { %1294 = vrsqrt.f32 %v666_v33  ;;  %v663_v38 = vmax.f32 %v660_v34, 0.0 }
 0x110   : > { %v655_v39 = vmul.f32 0.125, %v652_v36  ;;  %v658_v40 = vmul.f32 %v631_v35, %v631_v35 }
 0x111   : > { %v667_v41 = vadd.f32 1e-05, %v663_v38 }
 0x112   : > { %v661_v42 = vsub.f32 %v655_v39, %v658_v40 }
 0x113   : > { %1296 = vrsqrt.f32 %v667_v41 }
 0x114   : > { %v664_v44 = vmax.f32 %v661_v42, 0.0 }
 0x116   : > { %v668_v45 = vadd.f32 1e-05, %v664_v44 }
 0x118   : > { %1298 = vrsqrt.f32 %v668_v45 }
 0x11c   : > { %v1295_v50 = vpop.eup %1294 }
 0x11d   : > { %v672_v51 = vmul.f32 %v1295_v50, %v665_v47 }
 0x11f   : > { %v676_v53 = vmul.f32 %v672_v51, %v629_v10  ;;  %v688_v54 = vrot.slane %v672_v51, %v1562_v49 }
 0x120   : > { %v1297_v55 = vpop.eup %1296 }
 0x121   : > { %v679_v56 = vsub.f32 %v675_v52, %v676_v53  ;;  %v673_v57 = vmul.f32 %v1297_v55, %v665_v47  ;;  %v700_v58 = vmul.f32 %v688_v54, %v1536_v37 }
 0x123   : > { %v709_v59 = vrot.slane %v679_v56, %v1562_v49  ;;  %v677_v60 = vmul.f32 %v673_v57, %v630_v24  ;;  %v692_v62 = vrot.slane %v673_v57, %v1562_v49 }
 0x125   : > { %v1299_v63 = vpop.eup %1298  ;;  %v721_v0 = vadd.f32 %v709_v59, %v700_v58  ;;  %v680_v1 = vsub.f32 %v675_v52, %v677_v60  ;;  %v701_v4 = vmul.f32 %v692_v62, %v1542_v48 }
 0x126   : > { %v674_v2 = vmul.f32 %v1299_v63, %v665_v47 }
 0x127   : > { %v1098_v3 = vmul.f32 -1.442695, %v721_v0  ;;  %v713_v5 = vrot.slane %v680_v1, %v1562_v49 }
 0x128   : > { %v678_v6 = vmul.f32 %v674_v2, %v631_v35  ;;  %v696_v7 = vrot.slane %v674_v2, %v1562_v49 }
 0x129   : > { %1300 = vpow2.f32 %v1098_v3  ;;  %v722_v8 = vadd.f32 %v713_v5, %v701_v4 }
 0x12a   : > { %v681_v37 = vsub.f32 %v675_v52, %v678_v6  ;;  %v702_v10 = vmul.f32 %v696_v7, %v1548_v61 }
 0x12b   : > { %v1099_v9 = vmul.f32 -1.442695, %v722_v8 }
 0x12c   : > { %v717_v11 = vrot.slane %v681_v37, %v1562_v49 }
 0x12d   : > { %1302 = vpow2.f32 %v1099_v9 }
 0x12e   : > { %v723_v13 = vadd.f32 %v717_v11, %v702_v10 }
 0x130   : > { %v1100_v14 = vmul.f32 -1.442695, %v723_v13 }
 0x132   : > { %1304 = vpow2.f32 %v1100_v14 }
 0x136   : > { %v1301_v15 = vpop.eup %1300 }
 0x137   : > { %v733_v16 = vadd.f32 1.0, %v1301_v15 }
 0x139   : > { %1306 = vrcp.f32 %v733_v16 }
 0x13a   : > { %v1303_v48 = vpop.eup %1302 }
 0x13b   : > { %v734_v17 = vadd.f32 1.0, %v1303_v48 }
 0x13d   : > { %1308 = vrcp.f32 %v734_v17 }
 0x13f   : > { %v1305_v18 = vpop.eup %1304 }
 0x140   : > { %v735_v19 = vadd.f32 1.0, %v1305_v18 }
 0x142   : > { %1310 = vrcp.f32 %v735_v19 }
 0x146   : > { %v1307_v20 = vpop.eup %1306 }
 0x147   : > { %1242 = vmatmul.mubr.f32.vlgmr.msra.gmra.mxu0 %v1307_v20 }
 0x14a   : > { %v1309_v21 = vpop.eup %1308 }
 0x14b   : > { %1245 = vmatmul.mubr.f32.vlgmr.msra.gmra.mxu1 %v1309_v21 }
 0x14c   : > { %1247 = vmatprep.mubr.msk.f32.mxu1 %vm1339_vm0, %v1338_v12 }
 0x14f   : > { %v1311_v61 = vpop.eup %1310 }
 0x150   : > { %1248 = vmatmul.mubr.f32.gmra.mxu1 %v1311_v61 }
 0x207   : > { %v1575_v22 = vpop.f32.mrf.mxu0 }
 0x208   : > { %v838_v23 = vrot.slane %v1575_v22, 4  ;;  %v859_v24 = vmul.f32 %v1575_v22, %v1575_v22 }
 0x209   : > { %v1243_v25 = vpop.f32.mrf.mxu0 }
 0x20a   : > { %v839_v26 = vadd.f32 %v838_v23, %v1575_v22  ;;  %v862_v27 = vrot.slane %v859_v24, 4  ;;  %v892_v23 = vld [vmem:[%s366_s23] sm:$0x1] }
 0x20b   : > { %v1581_v28 = vpop.f32.mrf.mxu1 }
 0x20c   : > { %v840_v29 = vrot.slane %v839_v26, 2  ;;  %v863_v30 = vadd.f32 %v862_v27, %v859_v24  ;;  %v844_v31 = vrot.slane %v1581_v28, 4  ;;  %v860_v12 = vmul.f32 %v1581_v28, %v1581_v28 }
 0x20d   : > { %v1246_v32 = vpop.f32.mrf.mxu1 }
 0x20e   : > { %v841_v33 = vadd.f32 %v840_v29, %v839_v26  ;;  %v864_v34 = vrot.slane %v863_v30, 2  ;;  %v845_v35 = vadd.f32 %v844_v31, %v1581_v28  ;;  %v868_v36 = vrot.slane %v860_v12, 4  ;;  %v902_v26 = vld [vmem:[%s369_s28] sm:$0x1] }
 0x210   : > { %v842_v38 = vrot.slane %v841_v33, 1  ;;  %v865_v39 = vadd.f32 %v864_v34, %v863_v30  ;;  %v846_v40 = vrot.slane %v845_v35, 2  ;;  %v869_v41 = vadd.f32 %v868_v36, %v860_v12  ;;  %v1587_v42 = vpop.f32.mrf.mxu1 }
 0x211   : > { %v850_v43 = vrot.slane %v1587_v42, 4  ;;  %v861_v44 = vmul.f32 %v1587_v42, %v1587_v42 }
 0x212   : > { %v843_v45 = vadd.f32 %v842_v38, %v841_v33  ;;  %v866_v46 = vrot.slane %v865_v39, 1  ;;  %v847_v47 = vadd.f32 %v846_v40, %v845_v35  ;;  %v870_v50 = vrot.slane %v869_v41, 2  ;;  %v1249_v51 = vpop.f32.mrf.mxu1 }
 0x213   : > { %v851_v52 = vadd.f32 %v850_v43, %v1587_v42  ;;  %v874_v53 = vrot.slane %v861_v44, 4 }
 0x214   : > { %v856_v54 = vmul.f32 0.125, %v843_v45  ;;  %v867_v55 = vadd.f32 %v866_v46, %v865_v39  ;;  %v848_v56 = vrot.slane %v847_v47, 1  ;;  %v871_v57 = vadd.f32 %v870_v50, %v869_v41 }
 0x215   : > { %v852_v58 = vrot.slane %v851_v52, 2  ;;  %v875_v59 = vadd.f32 %v874_v53, %v861_v44 }
 0x216   : > { %v880_v60 = vmul.f32 0.125, %v867_v55  ;;  %v883_v62 = vmul.f32 %v856_v54, %v856_v54  ;;  %v849_v63 = vadd.f32 %v848_v56, %v847_v47  ;;  %v872_v0 = vrot.slane %v871_v57, 1 }
 0x217   : > { %v853_v1 = vadd.f32 %v852_v58, %v851_v52  ;;  %v876_v2 = vrot.slane %v875_v59, 2 }
 0x218   : > { %v886_v3 = vsub.f32 %v880_v60, %v883_v62  ;;  %v857_v4 = vmul.f32 0.125, %v849_v63  ;;  %v873_v5 = vadd.f32 %v872_v0, %v871_v57 }
 0x219   : > { %v854_v6 = vrot.slane %v853_v1, 1  ;;  %v877_v7 = vadd.f32 %v876_v2, %v875_v59 }
 0x21a   : > { %v889_v8 = vmax.f32 %v886_v3, 0.0  ;;  %v881_v37 = vmul.f32 0.125, %v873_v5  ;;  %v884_v9 = vmul.f32 %v857_v4, %v857_v4 }
 0x21b   : > { %v855_v10 = vadd.f32 %v854_v6, %v853_v1  ;;  %v878_v11 = vrot.slane %v877_v7, 1 }
 0x21c   : > { %v893_v13 = vadd.f32 1e-05, %v889_v8  ;;  %v887_v14 = vsub.f32 %v881_v37, %v884_v9 }
 0x21d   : > { %v858_v15 = vmul.f32 0.125, %v855_v10  ;;  %v879_v16 = vadd.f32 %v878_v11, %v877_v7 }
 0x21e   : > { %1312 = vrsqrt.f32 %v893_v13  ;;  %v890_v48 = vmax.f32 %v887_v14, 0.0 }
 0x21f   : > { %v882_v17 = vmul.f32 0.125, %v879_v16  ;;  %v885_v18 = vmul.f32 %v858_v15, %v858_v15 }
 0x220   : > { %v894_v19 = vadd.f32 1e-05, %v890_v48 }
 0x221   : > { %v888_v20 = vsub.f32 %v882_v17, %v885_v18 }
 0x222   : > { %1314 = vrsqrt.f32 %v894_v19 }
 0x223   : > { %v891_v21 = vmax.f32 %v888_v20, 0.0 }
 0x225   : > { %v895_v61 = vadd.f32 1e-05, %v891_v21 }
 0x227   : > { %1316 = vrsqrt.f32 %v895_v61 }
 0x22b   : > { %v1313_v24 = vpop.eup %1312 }
 0x22c   : > { %v899_v25 = vmul.f32 %v1313_v24, %v892_v23 }
 0x22e   : > { %v903_v27 = vmul.f32 %v899_v25, %v856_v54  ;;  %v915_v29 = vrot.slane %v899_v25, %v1562_v49 }
 0x22f   : > { %v1315_v30 = vpop.eup %1314 }
 0x230   : > { %v906_v31 = vsub.f32 %v902_v26, %v903_v27  ;;  %v900_v12 = vmul.f32 %v1315_v30, %v892_v23  ;;  %v927_v32 = vmul.f32 %v915_v29, %v1575_v22 }
 0x232   : > { %v936_v33 = vrot.slane %v906_v31, %v1562_v49  ;;  %v904_v34 = vmul.f32 %v900_v12, %v857_v4  ;;  %v919_v35 = vrot.slane %v900_v12, %v1562_v49 }
 0x234   : > { %v1317_v36 = vpop.eup %1316  ;;  %v948_v38 = vadd.f32 %v936_v33, %v927_v32  ;;  %v907_v39 = vsub.f32 %v902_v26, %v904_v34  ;;  %v928_v43 = vmul.f32 %v919_v35, %v1581_v28 }
 0x235   : > { %v901_v40 = vmul.f32 %v1317_v36, %v892_v23 }
 0x236   : > { %v1101_v41 = vmul.f32 -1.442695, %v948_v38  ;;  %v940_v44 = vrot.slane %v907_v39, %v1562_v49 }
 0x237   : > { %v905_v45 = vmul.f32 %v901_v40, %v858_v15  ;;  %v923_v46 = vrot.slane %v901_v40, %v1562_v49 }
 0x238   : > { %1318 = vpow2.f32 %v1101_v41  ;;  %v949_v47 = vadd.f32 %v940_v44, %v928_v43 }
 0x239   : > { %v908_v22 = vsub.f32 %v902_v26, %v905_v45  ;;  %v929_v51 = vmul.f32 %v923_v46, %v1587_v42 }
 0x23a   : > { %v1102_v50 = vmul.f32 -1.442695, %v949_v47 }
 0x23b   : > { %v944_v52 = vrot.slane %v908_v22, %v1562_v49 }
 0x23c   : > { %1320 = vpow2.f32 %v1102_v50 }
 0x23d   : > { %v950_v53 = vadd.f32 %v944_v52, %v929_v51 }
 0x23f   : > { %v1103_v54 = vmul.f32 -1.442695, %v950_v53 }
 0x241   : > { %1322 = vpow2.f32 %v1103_v54 }
 0x245   : > { %v1319_v55 = vpop.eup %1318 }
 0x246   : > { %v960_v28 = vadd.f32 1.0, %v1319_v55 }
 0x248   : > { %1324 = vrcp.f32 %v960_v28 }
 0x249   : > { %v1321_v56 = vpop.eup %1320 }
 0x24a   : > { %v961_v57 = vadd.f32 1.0, %v1321_v56 }
 0x24c   : > { %1326 = vrcp.f32 %v961_v57 }
 0x24e   : > { %v1323_v58 = vpop.eup %1322 }
 0x24f   : > { %v962_v59 = vadd.f32 1.0, %v1323_v58 }
 0x251   : > { %1328 = vrcp.f32 %v962_v59 }
 0x255   : > { %v1325_v42 = vpop.eup %1324 }
 0x256   : > { %969 = vst [vmem:[%s374_s9] sm:$0xff] %v1325_v42 }
 0x259   : > { %v1327_v49 = vpop.eup %1326 }
 0x25a   : > { %970 = vst [vmem:[%s374_s9 + $0x8] sm:$0xff] %v1327_v49 }
 0x25e   : > { %v1329_v60 = vpop.eup %1328 }
 0x25f   : > { %971 = vst [vmem:[%s374_s9 + $0x10] sm:$0xff] %v1329_v60 }
 0x260 PF: > { %s17_s24 = sadd.s32 1, %s1336_s24  }
 0x261   : > { %p14_p4 = scmp.ge.s32.totalorder %s17_s24, 5  }
 0x263   :  { %16 = sbr.rel (!%p14_p4) target bundleno = 1 (0x1), region = 96 }

// kernel: _graph_layer_forward.2
= control target key start
LH: loop header
LB: loop body
LE: loop exit
PB: predicated region body
PF: predicated region fallthrough
CT: control target
= control target key end

     0   :  { %12 = vsyncpa [#allocation3], 0  ;;  %s1667_s0 = inlined_call_operand.vmem [shape: f32[7,4,8,128], index: 0, kind: input, shape index: {}]   ;;  %s1668_s1 = inlined_call_operand.vmem [shape: f32[7,128,128], index: 1, kind: input, shape index: {}]   ;;  %s1669_s2 = inlined_call_operand.vmem [shape: f32[7,1,128], index: 2, kind: input, shape index: {}]   ;;  %s1670_s3 = inlined_call_operand.vmem [shape: f32[7,1,128], index: 3, kind: input, shape index: {}]   ;;  %s1671_s4 = inlined_call_operand.hbm [shape: f32[7,128,128], index: 4, kind: input, shape index: {}]   ;;  %s1672_s5 = inlined_call_operand.vmem [shape: f32[7,1,128], index: 5, kind: input, shape index: {}]   ;;  %s1673_s6 = inlined_call_operand.vmem [shape: f32[7,1,128], index: 6, kind: input, shape index: {}]   ;;  %s1674_s7 = inlined_call_operand.vmem [shape: f32[7,4,8,128], index: 7, kind: output, shape index: {}]  }
   0x1   :  { %14 = vsyncpa [#allocation3 + $0x1], 0  ;;  %s1420_s24 = smov 0   ;;  %s1422_s25 = smov 0  }
   0x2   :  { %s1424_s26 = smov 0   ;;  %s1426_s27 = smov 0  }
   0x3 LB: > { %s1439_s28 = sadd.s32 4294967295, %s1375_s27   ;;  %s1442_s29 = sadd.s32 1, %s1375_s27   ;;  %s1375_s27 = sphi %s1426_s27, %s1683_s27   ;;  %s1371_s26 = sphi %s1424_s26, %s1682_s26   ;;  %s1367_s25 = sphi %s1422_s25, %s1681_s25   ;;  %s1363_s24 = sphi %s1420_s24, %s1680_s24  }
   0x4   : > { %s128_s30 = ssub.s32 %s1375_s27, %s1442_s29  ;;  %s131_s8 = sadd.s32 1, %s1371_s26 }
   0x5   : > { %p129_p0 = scmp.eq.s32.totalorder %s128_s30, 0  ;;  %p138_p1 = scmp.ne.s32.totalorder %s1371_s26, %s1367_s25 }
   0x6   : > { %p139_p2 = scmp.eq.s32.totalorder %s1375_s27, 0  ;;  %p144_p3 = scmp.ne.s32.totalorder %s1367_s25, %s1363_s24 }
   0x7   : > { %s1452_s9 = scalar_select %p129_p0, %s1371_s26, %s131_s8  }
   0x8   : > { %p140_p4 = por %p139_p2, %p138_p1  ;;  %p145_p5 = scmp.eq.s32.totalorder %s1439_s28, 0 }
   0x9   : > { %p1230_p6 = scmp.lt.s32.totalorder %s1375_s27, 7  ;;  %s274_s11 = sand.u32 1, %s1371_s26  }
   0xa   : > { %p1456_p7 = por %p145_p5, %p144_p3  ;;  %s1083_s12 = sshll.u32 %s274_s11, 7 }
   0xb   : > { %s1104_s13 = sshll.u32 %s1375_s27, 11  ;;  %s278_s17 = scalar_lea.vmem [#allocation2], %s1083_s12 }
   0xc   : > { %s1676_s10 = scalar_select %p1456_p7, 1, 0 }
   0xd   : > { %s1465_s16 = scalar_lea.hbm %s1671_s4, %s1104_s13  ;;  %s285_s18 = sshll.u32 %s278_s17, 4  ;;  %s1467_s18 = int_to_ptr.vmem [resolvable:$true] %s285_s18 }
   0xe   : > { %p1469_p8 = pnand %p1230_p6, %p140_p4  ;;  %s1474_s20 = scalar_lea.sflag [#allocation3], %s274_s11 }
   0xf   : > { %s1313_s21 = scalar_lea.hbm %s1465_s16, 2048  ;;  %s1318_s24 = scalar_lea.hbm %s1671_s4, 14336 }
  0x10   : > { %p1314_p10 = scmp.ne.s32.totalorder %s1465_s16, %s1313_s21  ;;  %p1315_p11 = pneg %p1469_p8 }
  0x11   : > { %p1319_p0 = scmp.lt.s32.totalorder %s1465_s16, %s1671_s4  ;;  %p1320_p1 = scmp.lt.s32.totalorder %s1318_s24, %s1313_s21 }
  0x12   : > { %p1316_p12 = pnand %p1315_p11, %p1314_p10 }
  0x13   : > { %p1321_p2 = por %p1320_p1, %p1319_p0 }
  0x14   : > { %p1317_p13 = pneg %p1316_p12 }
  0x16   : > { %p1322_p3 = pnand %p1321_p2, %p1317_p13 }
  0x18   : > { %1325 = shalt.err (!%p1322_p3)
}
  0x19   : > { %s1326_s11 = scalar_lea.vmem %s1467_s18, 2048  ;;  %s1377_s12 = smov [#allocation2]  }
  0x1a   : > { %p1327_p4 = scmp.ne.s32.totalorder %s1467_s18, %s1326_s11  ;;  %s1331_s13 = sshll.u32 %s1377_s12, 4  ;;  %s1332_s13 = int_to_ptr.vmem [resolvable:$false] %s1331_s13 }
  0x1b   : > { %s1333_s14 = scalar_lea.vmem %s1332_s13, 4096  ;;  %p1334_p10 = scmp.lt.s32.totalorder %s1467_s18, %s1332_s13 }
  0x1c   : > { %p1329_p5 = pnand %p1327_p4, %p1315_p11  ;;  %p1335_p12 = scmp.lt.s32.totalorder %s1333_s14, %s1326_s11 }
  0x1e   : > { %p1330_p6 = pneg %p1329_p5  ;;  %p1336_p9 = por %p1335_p12, %p1334_p10 }
  0x20   : > { %p1337_p7 = pnand %p1336_p9, %p1330_p6 }
  0x22   : > { %1340 = shalt.err (!%p1337_p7)
}
  0x23   : > { %s1378_s15 = smov 128   ;;  %s1379_s17 = smov 8  }
  0x24   : > { %1229 = dma.hbm_to_vmem [thread:$0]  (!%p1469_p8), %s1465_s16, 2048, %s1467_s18, %s1474_s20, %s1378_s15, %s1378_s15, %s1379_s17  }
  0x25   : > { %p305_p11 = scmp.lt.s32.totalorder %s1375_s27, 8  ;;  %p1678_p13 = scmp.ge.s32.totalorder %s1375_s27, 1 }
  0x27   : > { %p306_p0 = pnand %p1678_p13, %p305_p11 }
  0x28   : > { %s311_s21 = sand.u32 (!%p306_p0), 1, %s1367_s25   ;;  %p1679_p7 = scmp.ne.s32.totalorder (!%p306_p0), %s1676_s10, 0 }
  0x29   : > { %309 = sbr.rel (%p306_p0) target bundleno = 638 (0x27e), region = 48  ;;  %s1087_s22 = sshll.u32 (!%p306_p0), %s311_s21, 7 }
  0x2a   : > { %s312_s23 = scalar_lea.sflag (!%p306_p0), [#allocation3], %s311_s21  ;;  %s1499_s24 = scalar_lea.vmem (!%p306_p0), [#allocation2], %s1087_s22 }
  0x2e   : > { %1358 = dma.done.wait (%p1679_p7), %s312_s23, 2048  }
  0x2f   : > { %1360 = vsyncadd (%p1679_p7), %s312_s23, 4294965248  ;;  %p368_p9 = scmp.lt.s32.totalorder %s1439_s28, 6  ;;  %v689_v20 = vld [vmem:[%s1499_s24 + $0x78] sm:$0xff]  ;;  %v688_v21 = vld [vmem:[%s1499_s24 + $0x70] sm:$0xff] }
  0x30   : > { %1186 = vmatprep.subr.mxu1 %v689_v20  ;;  %v687_v22 = vld [vmem:[%s1499_s24 + $0x68] sm:$0xff]  ;;  %v686_v23 = vld [vmem:[%s1499_s24 + $0x60] sm:$0xff]  ;;  %v685_v24 = vld [vmem:[%s1499_s24 + $0x58] sm:$0xff] }
  0x31   : > { %s1685_s28 = smov (!%p368_p9, %s1439_s28), 6  ;;  %1187 = vmatpush3.msra.mxu1 %v689_v20  ;;  %v684_v25 = vld [vmem:[%s1499_s24 + $0x50] sm:$0xff]  ;;  %v683_v26 = vld [vmem:[%s1499_s24 + $0x48] sm:$0xff]  ;;  %v682_v27 = vld [vmem:[%s1499_s24 + $0x40] sm:$0xff] }
  0x32   : > { %s1106_s27 = sshll.u32 %s1685_s28, 7  ;;  %s1105_s10 = sshll.u32 %s1685_s28, 5  ;;  %1188 = vmatprep.subr.mxu1 %v688_v21  ;;  %v681_v28 = vld [vmem:[%s1499_s24 + $0x38] sm:$0xff]  ;;  %v680_v29 = vld [vmem:[%s1499_s24 + $0x30] sm:$0xff]  ;;  %v679_v30 = vld [vmem:[%s1499_s24 + $0x28] sm:$0xff] }
  0x33   : > { %s1513_s19 = scalar_lea.vmem %s1668_s1, %s1106_s27  ;;  %s1524_s8 = scalar_lea.vmem %s1667_s0, %s1105_s10  ;;  %1189 = vmatpush3.msra.mxu1 %v688_v21  ;;  %v678_v31 = vld [vmem:[%s1499_s24 + $0x20] sm:$0xff]  ;;  %v677_v32 = vld [vmem:[%s1499_s24 + $0x18] sm:$0xff]  ;;  %v676_v33 = vld [vmem:[%s1499_s24 + $0x10] sm:$0xff] }
  0x34   : > { %v414_v0 = vld [vmem:[%s1513_s19 + $0x78] sm:$0xff]  ;;  %v413_v1 = vld [vmem:[%s1513_s19 + $0x70] sm:$0xff]  ;;  %v412_v2 = vld [vmem:[%s1513_s19 + $0x68] sm:$0xff]  ;;  %1190 = vmatprep.subr.mxu1 %v687_v22  ;;  %s380_s13 = scalar_lea.vmem %s1669_s2, %s1685_s28  ;;  %s383_s17 = scalar_lea.vmem %s1670_s3, %s1685_s28 }
  0x35   : > { %1148 = vmatprep.subr.mxu0 %v414_v0  ;;  %v411_v3 = vld [vmem:[%s1513_s19 + $0x60] sm:$0xff]  ;;  %v410_v5 = vld [vmem:[%s1513_s19 + $0x58] sm:$0xff]  ;;  %v409_v6 = vld [vmem:[%s1513_s19 + $0x50] sm:$0xff]  ;;  %1191 = vmatpush3.msra.mxu1 %v687_v22  ;;  %s386_s23 = scalar_lea.vmem %s1672_s5, %s1685_s28  ;;  %s389_s16 = scalar_lea.vmem %s1673_s6, %s1685_s28 }
  0x36   : > { %1149 = vmatpush3.msra.mxu0 %v414_v0  ;;  %v395_v4 = vld [vmem:[%s1524_s8] sm:$0xff]  ;;  %v408_v7 = vld [vmem:[%s1513_s19 + $0x48] sm:$0xff]  ;;  %v406_v9 = vld [vmem:[%s1513_s19 + $0x38] sm:$0xff]  ;;  %1192 = vmatprep.subr.mxu1 %v686_v23  ;;  %s394_s20 = scalar_lea.vmem %s1674_s7, %s1105_s10 }
  0x37   : > { %1150 = vmatprep.subr.mxu0 %v413_v1  ;;  %1180 = vmatprep.mubr.f32.mxu0 %v395_v4  ;;  %v407_v8 = vld [vmem:[%s1513_s19 + $0x40] sm:$0xff]  ;;  %v405_v10 = vld [vmem:[%s1513_s19 + $0x30] sm:$0xff]  ;;  %v404_v11 = vld [vmem:[%s1513_s19 + $0x28] sm:$0xff] }
  0x38   : > { %1151 = vmatpush3.msra.mxu0 %v413_v1  ;;  %v403_v12 = vld [vmem:[%s1513_s19 + $0x20] sm:$0xff]  ;;  %v402_v13 = vld [vmem:[%s1513_s19 + $0x18] sm:$0xff]  ;;  %v401_v14 = vld [vmem:[%s1513_s19 + $0x10] sm:$0xff]  ;;  %1193 = vmatpush3.msra.mxu1 %v686_v23 }
  0x39   : > { %1152 = vmatprep.subr.mxu0 %v412_v2  ;;  %v400_v15 = vld [vmem:[%s1513_s19 + $0x8] sm:$0xff]  ;;  %v399_v16 = vld [vmem:[%s1513_s19] sm:$0xff]  ;;  %v397_v18 = vld [vmem:[%s1524_s8 + $0x10] sm:$0xff]  ;;  %1194 = vmatprep.subr.mxu1 %v685_v24 }
  0x3a   : > { %1153 = vmatpush3.msra.mxu0 %v412_v2  ;;  %v396_v17 = vld [vmem:[%s1524_s8 + $0x8] sm:$0xff]  ;;  %v398_v19 = vld [vmem:[%s1524_s8 + $0x18] sm:$0xff]  ;;  %1195 = vmatpush3.msra.mxu1 %v685_v24  ;;  %v674_v35 = vld [vmem:[%s1499_s24] sm:$0xff] }
  0x3b   : > { %1154 = vmatprep.subr.mxu0 %v411_v3  ;;  %1196 = vmatprep.subr.mxu1 %v684_v25  ;;  %v675_v34 = vld [vmem:[%s1499_s24 + $0x8] sm:$0xff] }
  0x3c   : > { %1155 = vmatpush3.msra.mxu0 %v411_v3  ;;  %1197 = vmatpush3.msra.mxu1 %v684_v25 }
  0x3d   : > { %1156 = vmatprep.subr.mxu0 %v410_v5  ;;  %1198 = vmatprep.subr.mxu1 %v683_v26 }
  0x3e   : > { %1157 = vmatpush3.msra.mxu0 %v410_v5  ;;  %1199 = vmatpush3.msra.mxu1 %v683_v26 }
  0x3f   : > { %1158 = vmatprep.subr.mxu0 %v409_v6  ;;  %1200 = vmatprep.subr.mxu1 %v682_v27 }
  0x40   : > { %1159 = vmatpush3.msra.mxu0 %v409_v6  ;;  %1201 = vmatpush3.msra.mxu1 %v682_v27 }
  0x41   : > { %1160 = vmatprep.subr.mxu0 %v408_v7  ;;  %1202 = vmatprep.subr.mxu1 %v681_v28 }
  0x42   : > { %1161 = vmatpush3.msra.mxu0 %v408_v7  ;;  %1203 = vmatpush3.msra.mxu1 %v681_v28 }
  0x43   : > { %1162 = vmatprep.subr.mxu0 %v407_v8  ;;  %1204 = vmatprep.subr.mxu1 %v680_v29 }
  0x44   : > { %1163 = vmatpush3.msra.mxu0 %v407_v8  ;;  %1205 = vmatpush3.msra.mxu1 %v680_v29 }
  0x45   : > { %1164 = vmatprep.subr.mxu0 %v406_v9  ;;  %1206 = vmatprep.subr.mxu1 %v679_v30 }
  0x46   : > { %1165 = vmatpush3.msra.mxu0 %v406_v9  ;;  %1207 = vmatpush3.msra.mxu1 %v679_v30 }
  0x47   : > { %1166 = vmatprep.subr.mxu0 %v405_v10  ;;  %1208 = vmatprep.subr.mxu1 %v678_v31 }
  0x48   : > { %1167 = vmatpush3.msra.mxu0 %v405_v10  ;;  %1209 = vmatpush3.msra.mxu1 %v678_v31 }
  0x49   : > { %1168 = vmatprep.subr.mxu0 %v404_v11  ;;  %1210 = vmatprep.subr.mxu1 %v677_v32 }
  0x4a   : > { %1169 = vmatpush3.msra.mxu0 %v404_v11  ;;  %1211 = vmatpush3.msra.mxu1 %v677_v32 }
  0x4b   : > { %1170 = vmatprep.subr.mxu0 %v403_v12  ;;  %1212 = vmatprep.subr.mxu1 %v676_v33 }
  0x4c   : > { %1171 = vmatpush3.msra.mxu0 %v403_v12  ;;  %1213 = vmatpush3.msra.mxu1 %v676_v33 }
  0x4d   : > { %1172 = vmatprep.subr.mxu0 %v402_v13  ;;  %1214 = vmatprep.subr.mxu1 %v675_v34 }
  0x4e   : > { %1173 = vmatpush3.msra.mxu0 %v402_v13  ;;  %1215 = vmatpush3.msra.mxu1 %v675_v34 }
  0x4f   : > { %1174 = vmatprep.subr.mxu0 %v401_v14  ;;  %1216 = vmatprep.subr.mxu1 %v674_v35 }
  0x50   : > { %1175 = vmatpush3.msra.mxu0 %v401_v14  ;;  %1217 = vmatpush3.msra.mxu1 %v674_v35 }
  0x51   : > { %1176 = vmatprep.subr.mxu0 %v400_v15 }
  0x52   : > { %1177 = vmatpush3.msra.mxu0 %v400_v15 }
  0x53   : > { %1178 = vmatprep.subr.mxu0 %v399_v16 }
  0x54   : > { %1179 = vmatpush3.msra.mxu0 %v399_v16 }
  0x55   : > { %1181 = vmatmul.mubr.f32.vlgmr.msra.gmra.mxu0 %v396_v17 }
  0x56   : > { %1183 = vmatprep.mubr.f32.mxu0 %v397_v18 }
  0x59   : > { %1184 = vmatmul.mubr.f32.gmra.mxu0 %v398_v19 }
 0x115   : > { %v1559_v36 = vpop.f32.mrf.mxu0 }
 0x116   : > { %v506_v37 = vrot.slane %v1559_v36, 4  ;;  %v529_v38 = vmul.f32 %v1559_v36, %v1559_v36 }
 0x117   : > { %v1564_v39 = vpop.f32.mrf.mxu0 }
 0x118   : > { %v507_v40 = vadd.f32 %v1559_v36, %v506_v37  ;;  %v538_v41 = vrot.slane %v529_v38, 4  ;;  %v500_v42 = vrot.slane %v1564_v39, 4  ;;  %v528_v43 = vmul.f32 %v1564_v39, %v1564_v39 }
 0x119   : > { %v1570_v44 = vpop.f32.mrf.mxu0 }
 0x11a   : > { %v508_v45 = vrot.slane %v507_v40, 2  ;;  %v539_v46 = vadd.f32 %v538_v41, %v529_v38  ;;  %v501_v47 = vadd.f32 %v500_v42, %v1564_v39  ;;  %v532_v48 = vrot.slane %v528_v43, 4 }
 0x11b   : > { %v518_v49 = vrot.slane %v1570_v44, 4  ;;  %v531_v50 = vmul.f32 %v1570_v44, %v1570_v44  ;;  %v1576_v51 = vpop.f32.mrf.mxu0 }
 0x11c   : > { %v509_v52 = vadd.f32 %v508_v45, %v507_v40  ;;  %v540_v53 = vrot.slane %v539_v46, 2  ;;  %v502_v54 = vrot.slane %v501_v47, 2  ;;  %v533_v55 = vadd.f32 %v532_v48, %v528_v43 }
 0x11d   : > { %v519_v56 = vadd.f32 %v1570_v44, %v518_v49  ;;  %v550_v57 = vrot.slane %v531_v50, 4  ;;  %v512_v58 = vrot.slane %v1576_v51, 4  ;;  %v530_v59 = vmul.f32 %v1576_v51, %v1576_v51 }
 0x11e   : > { %v510_v60 = vrot.slane %v509_v52, 1  ;;  %v541_v61 = vadd.f32 %v540_v53, %v539_v46  ;;  %v503_v62 = vadd.f32 %v502_v54, %v501_v47  ;;  %v534_v63 = vrot.slane %v533_v55, 2 }
 0x11f   : > { %v520_v0 = vrot.slane %v519_v56, 2  ;;  %v551_v1 = vadd.f32 %v550_v57, %v531_v50  ;;  %v513_v2 = vadd.f32 %v512_v58, %v1576_v51  ;;  %v544_v3 = vrot.slane %v530_v59, 4  ;;  %v572_v58 = vld [vmem:[%s380_s13] sm:$0x1] }
 0x120   : > { %v511_v4 = vadd.f32 %v510_v60, %v509_v52  ;;  %v542_v5 = vrot.slane %v541_v61, 1  ;;  %v504_v6 = vrot.slane %v503_v62, 1  ;;  %v535_v7 = vadd.f32 %v534_v63, %v533_v55  ;;  %v585_v63 = vld [vmem:[%s383_s17] sm:$0x1] }
 0x121   : > { %v521_v8 = vadd.f32 %v520_v0, %v519_v56  ;;  %v552_v9 = vrot.slane %v551_v1, 2  ;;  %v514_v10 = vrot.slane %v513_v2, 2  ;;  %v545_v11 = vadd.f32 %v544_v3, %v530_v59 }
 0x122   : > { %v525_v12 = vmul.f32 0.125, %v511_v4  ;;  %v543_v13 = vadd.f32 %v542_v5, %v541_v61  ;;  %v505_v14 = vadd.f32 %v504_v6, %v503_v62  ;;  %v536_v15 = vrot.slane %v535_v7, 1 }
 0x123   : > { %v522_v16 = vrot.slane %v521_v8, 1  ;;  %v553_v17 = vadd.f32 %v552_v9, %v551_v1  ;;  %v515_v18 = vadd.f32 %v514_v10, %v513_v2  ;;  %v546_v19 = vrot.slane %v545_v11, 2 }
 0x124   : > { %v557_v20 = vmul.f32 0.125, %v543_v13  ;;  %v561_v21 = vmul.f32 %v525_v12, %v525_v12  ;;  %v524_v22 = vmul.f32 0.125, %v505_v14  ;;  %v537_v23 = vadd.f32 %v536_v15, %v535_v7 }
 0x125   : > { %v523_v24 = vadd.f32 %v522_v16, %v521_v8  ;;  %v554_v25 = vrot.slane %v553_v17, 1  ;;  %v516_v26 = vrot.slane %v515_v18, 1  ;;  %v547_v27 = vadd.f32 %v546_v19, %v545_v11 }
 0x126   : > { %v565_v28 = vsub.f32 %v557_v20, %v561_v21  ;;  %v556_v29 = vmul.f32 0.125, %v537_v23  ;;  %v560_v30 = vmul.f32 %v524_v22, %v524_v22  ;;  %v598_v55 = vlaneseq }
 0x127   : > { %v527_v31 = vmul.f32 0.125, %v523_v24  ;;  %v555_v32 = vadd.f32 %v554_v25, %v553_v17  ;;  %v517_v33 = vadd.f32 %v516_v26, %v515_v18  ;;  %v548_v34 = vrot.slane %v547_v27, 1 }
 0x128   : > { %v569_v35 = vmax.f32 %v565_v28, 0.0  ;;  %v564_v37 = vsub.f32 %v556_v29, %v560_v30  ;;  %v599_v57 = vshrl.u32 %v598_v55, 7 }
 0x129   : > { %v559_v38 = vmul.f32 0.125, %v555_v32  ;;  %v563_v40 = vmul.f32 %v527_v31, %v527_v31  ;;  %v526_v41 = vmul.f32 0.125, %v517_v33  ;;  %v549_v42 = vadd.f32 %v548_v34, %v547_v27 }
 0x12a   : > { %v574_v43 = vadd.f32 1e-05, %v569_v35  ;;  %v568_v45 = vmax.f32 %v564_v37, 0.0  ;;  %v1591_v59 = vsub.s32 0, %v599_v57 }
 0x12b   : > { %v567_v46 = vsub.f32 %v559_v38, %v563_v40  ;;  %v558_v47 = vmul.f32 0.125, %v549_v42  ;;  %v562_v48 = vmul.f32 %v526_v41, %v526_v41 }
 0x12c   : > { %1265 = vrsqrt.f32 %v574_v43  ;;  %v573_v49 = vadd.f32 1e-05, %v568_v45 }
 0x12d   : > { %v571_v50 = vmax.f32 %v567_v46, 0.0  ;;  %v566_v52 = vsub.f32 %v558_v47, %v562_v48 }
 0x12e   : > { %1267 = vrsqrt.f32 %v573_v49 }
 0x12f   : > { %v576_v53 = vadd.f32 1e-05, %v571_v50  ;;  %v570_v54 = vmax.f32 %v566_v52, 0.0 }
 0x131   : > { %1269 = vrsqrt.f32 %v576_v53  ;;  %v575_v56 = vadd.f32 1e-05, %v570_v54 }
 0x133   : > { %1271 = vrsqrt.f32 %v575_v56 }
 0x139   : > { %v1266_v60 = vpop.eup %1265 }
 0x13a   : > { %v582_v61 = vmul.f32 %v1266_v60, %v572_v58 }
 0x13b   : > { %v1268_v62 = vpop.eup %1267 }
 0x13c   : > { %v587_v0 = vmul.f32 %v582_v61, %v525_v12  ;;  %v605_v1 = vrot.slane %v582_v61, %v1591_v59  ;;  %v581_v2 = vmul.f32 %v1268_v62, %v572_v58 }
 0x13e   : > { %v1270_v3 = vpop.eup %1269  ;;  %v591_v4 = vsub.f32 %v585_v63, %v587_v0  ;;  %v586_v5 = vmul.f32 %v581_v2, %v524_v22  ;;  %v601_v6 = vrot.slane %v581_v2, %v1591_v59  ;;  %v619_v9 = vmul.f32 %v1559_v36, %v605_v1 }
 0x13f   : > { %v584_v7 = vmul.f32 %v1270_v3, %v572_v58 }
 0x140   : > { %v1272_v8 = vpop.eup %1271  ;;  %v633_v10 = vrot.slane %v591_v4, %v1591_v59  ;;  %v590_v11 = vsub.f32 %v585_v63, %v586_v5  ;;  %v618_v16 = vmul.f32 %v601_v6, %v1564_v39 }
 0x141   : > { %v589_v13 = vmul.f32 %v584_v7, %v527_v31  ;;  %v613_v14 = vrot.slane %v584_v7, %v1591_v59  ;;  %v583_v15 = vmul.f32 %v1272_v8, %v572_v58 }
 0x142   : > { %v647_v12 = vadd.f32 %v633_v10, %v619_v9  ;;  %v629_v17 = vrot.slane %v590_v11, %v1591_v59 }
 0x143   : > { %v593_v18 = vsub.f32 %v585_v63, %v589_v13  ;;  %v588_v19 = vmul.f32 %v583_v15, %v526_v41  ;;  %v609_v20 = vrot.slane %v583_v15, %v1591_v59  ;;  %v621_v36 = vmul.f32 %v1570_v44, %v613_v14 }
 0x144   : > { %v1095_v21 = vmul.f32 -1.442695, %v647_v12  ;;  %v646_v22 = vadd.f32 %v629_v17, %v618_v16 }
 0x145   : > { %v641_v23 = vrot.slane %v593_v18, %v1591_v59  ;;  %v592_v24 = vsub.f32 %v585_v63, %v588_v19  ;;  %v620_v27 = vmul.f32 %v609_v20, %v1576_v51 }
 0x146   : > { %1273 = vpow2.f32 %v1095_v21  ;;  %v1094_v25 = vmul.f32 -1.442695, %v646_v22 }
 0x147   : > { %v649_v26 = vadd.f32 %v641_v23, %v621_v36  ;;  %v637_v39 = vrot.slane %v592_v24, %v1591_v59 }
 0x148   : > { %1275 = vpow2.f32 %v1094_v25 }
 0x149   : > { %v1097_v28 = vmul.f32 -1.442695, %v649_v26  ;;  %v648_v29 = vadd.f32 %v637_v39, %v620_v27 }
 0x14b   : > { %1277 = vpow2.f32 %v1097_v28  ;;  %v1096_v30 = vmul.f32 -1.442695, %v648_v29 }
 0x14d   : > { %1279 = vpow2.f32 %v1096_v30 }
 0x153   : > { %v1274_v31 = vpop.eup %1273 }
 0x154   : > { %v663_v33 = vadd.f32 1.0, %v1274_v31 }
 0x155   : > { %v1276_v32 = vpop.eup %1275 }
 0x156   : > { %v662_v44 = vadd.f32 1.0, %v1276_v32 }
 0x158   : > { %v1278_v34 = vpop.eup %1277  ;;  %1281 = vrcp.f32 %v662_v44 }
 0x159   : > { %1283 = vrcp.f32 %v663_v33  ;;  %v665_v37 = vadd.f32 1.0, %v1278_v34 }
 0x15a   : > { %v1280_v35 = vpop.eup %1279 }
 0x15b   : > { %v664_v38 = vadd.f32 1.0, %v1280_v35 }
 0x15d   : > { %1285 = vrcp.f32 %v664_v38 }
 0x15e   : > { %1287 = vrcp.f32 %v665_v37 }
 0x165   : > { %v1282_v51 = vpop.eup %1281 }
 0x166   : > { %v1284_v40 = vpop.eup %1283  ;;  %1218 = vmatprep.mubr.f32.mxu1 %v1282_v51 }
 0x167   : > { %1219 = vmatmul.mubr.f32.vlgmr.msra.gmra.mxu1 %v1284_v40 }
 0x16a   : > { %v1286_v41 = vpop.eup %1285 }
 0x16b   : > { %v1288_v42 = vpop.eup %1287  ;;  %1221 = vmatprep.mubr.f32.mxu1 %v1286_v41 }
 0x16c   : > { %1222 = vmatmul.mubr.f32.gmra.mxu1 %v1288_v42 }
 0x227   : > { %v1605_v43 = vpop.f32.mrf.mxu1 }
 0x228   : > { %v781_v45 = vrot.slane %v1605_v43, 4  ;;  %v804_v46 = vmul.f32 %v1605_v43, %v1605_v43 }
 0x229   : > { %v1610_v47 = vpop.f32.mrf.mxu1 }
 0x22a   : > { %v782_v48 = vadd.f32 %v1605_v43, %v781_v45  ;;  %v813_v49 = vrot.slane %v804_v46, 4  ;;  %v775_v50 = vrot.slane %v1610_v47, 4  ;;  %v803_v52 = vmul.f32 %v1610_v47, %v1610_v47 }
 0x22c   : > { %v783_v53 = vrot.slane %v782_v48, 2  ;;  %v814_v54 = vadd.f32 %v813_v49, %v804_v46  ;;  %v776_v55 = vadd.f32 %v775_v50, %v1610_v47  ;;  %v807_v56 = vrot.slane %v803_v52, 4  ;;  %v1617_v57 = vpop.f32.mrf.mxu1 }
 0x22d   : > { %v793_v58 = vrot.slane %v1617_v57, 4  ;;  %v806_v60 = vmul.f32 %v1617_v57, %v1617_v57 }
 0x22e   : > { %v784_v61 = vadd.f32 %v783_v53, %v782_v48  ;;  %v815_v62 = vrot.slane %v814_v54, 2  ;;  %v777_v63 = vrot.slane %v776_v55, 2  ;;  %v808_v0 = vadd.f32 %v807_v56, %v803_v52  ;;  %v1622_v1 = vpop.f32.mrf.mxu1 }
 0x22f   : > { %v794_v2 = vadd.f32 %v1617_v57, %v793_v58  ;;  %v825_v3 = vrot.slane %v806_v60, 4  ;;  %v787_v4 = vrot.slane %v1622_v1, 4  ;;  %v805_v5 = vmul.f32 %v1622_v1, %v1622_v1 }
 0x230   : > { %v785_v6 = vrot.slane %v784_v61, 1  ;;  %v816_v7 = vadd.f32 %v815_v62, %v814_v54  ;;  %v778_v8 = vadd.f32 %v777_v63, %v776_v55  ;;  %v809_v9 = vrot.slane %v808_v0, 2 }
 0x231   : > { %v795_v10 = vrot.slane %v794_v2, 2  ;;  %v826_v11 = vadd.f32 %v825_v3, %v806_v60  ;;  %v788_v13 = vadd.f32 %v787_v4, %v1622_v1  ;;  %v819_v14 = vrot.slane %v805_v5, 4  ;;  %v847_v3 = vld [vmem:[%s386_s23] sm:$0x1] }
 0x232   : > { %v786_v15 = vadd.f32 %v785_v6, %v784_v61  ;;  %v817_v12 = vrot.slane %v816_v7, 1  ;;  %v779_v16 = vrot.slane %v778_v8, 1  ;;  %v810_v17 = vadd.f32 %v809_v9, %v808_v0 }
 0x233   : > { %v796_v18 = vadd.f32 %v795_v10, %v794_v2  ;;  %v827_v19 = vrot.slane %v826_v11, 2  ;;  %v789_v20 = vrot.slane %v788_v13, 2  ;;  %v820_v21 = vadd.f32 %v819_v14, %v805_v5 }
 0x234   : > { %v800_v22 = vmul.f32 0.125, %v786_v15  ;;  %v818_v36 = vadd.f32 %v817_v12, %v816_v7  ;;  %v780_v23 = vadd.f32 %v779_v16, %v778_v8  ;;  %v811_v24 = vrot.slane %v810_v17, 1  ;;  %v860_v7 = vld [vmem:[%s389_s16] sm:$0x1] }
 0x235   : > { %v797_v25 = vrot.slane %v796_v18, 1  ;;  %v828_v26 = vadd.f32 %v827_v19, %v826_v11  ;;  %v790_v27 = vadd.f32 %v789_v20, %v788_v13  ;;  %v821_v39 = vrot.slane %v820_v21, 2 }
 0x236   : > { %v832_v28 = vmul.f32 0.125, %v818_v36  ;;  %v836_v29 = vmul.f32 %v800_v22, %v800_v22  ;;  %v799_v30 = vmul.f32 0.125, %v780_v23  ;;  %v812_v31 = vadd.f32 %v811_v24, %v810_v17 }
 0x237   : > { %v798_v32 = vadd.f32 %v797_v25, %v796_v18  ;;  %v829_v33 = vrot.slane %v828_v26, 1  ;;  %v791_v44 = vrot.slane %v790_v27, 1  ;;  %v822_v34 = vadd.f32 %v821_v39, %v820_v21 }
 0x238   : > { %v840_v35 = vsub.f32 %v832_v28, %v836_v29  ;;  %v831_v37 = vmul.f32 0.125, %v812_v31  ;;  %v835_v38 = vmul.f32 %v799_v30, %v799_v30 }
 0x239   : > { %v802_v51 = vmul.f32 0.125, %v798_v32  ;;  %v830_v40 = vadd.f32 %v829_v33, %v828_v26  ;;  %v792_v41 = vadd.f32 %v791_v44, %v790_v27  ;;  %v823_v42 = vrot.slane %v822_v34, 1 }
 0x23a   : > { %v844_v45 = vmax.f32 %v840_v35, 0.0  ;;  %v839_v46 = vsub.f32 %v831_v37, %v835_v38 }
 0x23b   : > { %v834_v48 = vmul.f32 0.125, %v830_v40  ;;  %v838_v49 = vmul.f32 %v802_v51, %v802_v51  ;;  %v801_v50 = vmul.f32 0.125, %v792_v41  ;;  %v824_v52 = vadd.f32 %v823_v42, %v822_v34 }
 0x23c   : > { %v849_v53 = vadd.f32 1e-05, %v844_v45  ;;  %v843_v54 = vmax.f32 %v839_v46, 0.0 }
 0x23d   : > { %v842_v55 = vsub.f32 %v834_v48, %v838_v49  ;;  %v833_v56 = vmul.f32 0.125, %v824_v52  ;;  %v837_v58 = vmul.f32 %v801_v50, %v801_v50 }
 0x23e   : > { %1289 = vrsqrt.f32 %v849_v53  ;;  %v848_v60 = vadd.f32 1e-05, %v843_v54 }
 0x23f   : > { %v846_v61 = vmax.f32 %v842_v55, 0.0  ;;  %v841_v62 = vsub.f32 %v833_v56, %v837_v58 }
 0x240   : > { %1291 = vrsqrt.f32 %v848_v60 }
 0x241   : > { %v851_v63 = vadd.f32 1e-05, %v846_v61  ;;  %v845_v0 = vmax.f32 %v841_v62, 0.0 }
 0x243   : > { %1293 = vrsqrt.f32 %v851_v63  ;;  %v850_v2 = vadd.f32 1e-05, %v845_v0 }
 0x245   : > { %1295 = vrsqrt.f32 %v850_v2 }
 0x24b   : > { %v1290_v4 = vpop.eup %1289 }
 0x24c   : > { %v857_v5 = vmul.f32 %v1290_v4, %v847_v3 }
 0x24d   : > { %v1292_v6 = vpop.eup %1291 }
 0x24e   : > { %v862_v8 = vmul.f32 %v857_v5, %v800_v22  ;;  %v880_v9 = vrot.slane %v857_v5, %v1591_v59  ;;  %v856_v10 = vmul.f32 %v1292_v6, %v847_v3 }
 0x250   : > { %v1294_v11 = vpop.eup %1293  ;;  %v866_v13 = vsub.f32 %v860_v7, %v862_v8  ;;  %v861_v14 = vmul.f32 %v856_v10, %v799_v30  ;;  %v876_v15 = vrot.slane %v856_v10, %v1591_v59  ;;  %v894_v17 = vmul.f32 %v1605_v43, %v880_v9 }
 0x251   : > { %v859_v12 = vmul.f32 %v1294_v11, %v847_v3 }
 0x252   : > { %v1296_v16 = vpop.eup %1295  ;;  %v908_v18 = vrot.slane %v866_v13, %v1591_v59  ;;  %v865_v19 = vsub.f32 %v860_v7, %v861_v14  ;;  %v893_v23 = vmul.f32 %v876_v15, %v1610_v47 }
 0x253   : > { %v864_v20 = vmul.f32 %v859_v12, %v802_v51  ;;  %v888_v21 = vrot.slane %v859_v12, %v1591_v59  ;;  %v858_v36 = vmul.f32 %v1296_v16, %v847_v3 }
 0x254   : > { %v922_v22 = vadd.f32 %v908_v18, %v894_v17  ;;  %v904_v24 = vrot.slane %v865_v19, %v1591_v59 }
 0x255   : > { %v868_v25 = vsub.f32 %v860_v7, %v864_v20  ;;  %v863_v26 = vmul.f32 %v858_v36, %v801_v50  ;;  %v884_v27 = vrot.slane %v858_v36, %v1591_v59  ;;  %v896_v43 = vmul.f32 %v1617_v57, %v888_v21 }
 0x256   : > { %v1099_v39 = vmul.f32 -1.442695, %v922_v22  ;;  %v921_v28 = vadd.f32 %v904_v24, %v893_v23 }
 0x257   : > { %v916_v29 = vrot.slane %v868_v25, %v1591_v59  ;;  %v867_v30 = vsub.f32 %v860_v7, %v863_v26  ;;  %v895_v33 = vmul.f32 %v884_v27, %v1622_v1 }
 0x258   : > { %1297 = vpow2.f32 %v1099_v39  ;;  %v1098_v31 = vmul.f32 -1.442695, %v921_v28 }
 0x259   : > { %v924_v32 = vadd.f32 %v916_v29, %v896_v43  ;;  %v912_v47 = vrot.slane %v867_v30, %v1591_v59 }
 0x25a   : > { %1299 = vpow2.f32 %v1098_v31 }
 0x25b   : > { %v1101_v44 = vmul.f32 -1.442695, %v924_v32  ;;  %v923_v34 = vadd.f32 %v912_v47, %v895_v33 }
 0x25d   : > { %1301 = vpow2.f32 %v1101_v44  ;;  %v1100_v35 = vmul.f32 -1.442695, %v923_v34 }
 0x25f   : > { %1303 = vpow2.f32 %v1100_v35 }
 0x265   : > { %v1298_v37 = vpop.eup %1297 }
 0x266   : > { %v938_v38 = vadd.f32 1.0, %v1298_v37 }
 0x267   : > { %v1300_v57 = vpop.eup %1299 }
 0x268   : > { %1305 = vrcp.f32 %v938_v38  ;;  %v937_v51 = vadd.f32 1.0, %v1300_v57 }
 0x26a   : > { %v1302_v40 = vpop.eup %1301  ;;  %1307 = vrcp.f32 %v937_v51 }
 0x26b   : > { %v940_v41 = vadd.f32 1.0, %v1302_v40 }
 0x26c   : > { %v1304_v42 = vpop.eup %1303 }
 0x26d   : > { %1309 = vrcp.f32 %v940_v41  ;;  %v939_v1 = vadd.f32 1.0, %v1304_v42 }
 0x26f   : > { %1311 = vrcp.f32 %v939_v1 }
 0x275   : > { %v1306_v59 = vpop.eup %1305 }
 0x276   : > { %950 = vst [vmem:[%s394_s20 + $0x8] sm:$0xff] %v1306_v59 }
 0x277   : > { %v1308_v45 = vpop.eup %1307 }
 0x278   : > { %949 = vst [vmem:[%s394_s20] sm:$0xff] %v1308_v45 }
 0x27a   : > { %v1310_v46 = vpop.eup %1309 }
 0x27b   : > { %952 = vst [vmem:[%s394_s20 + $0x18] sm:$0xff] %v1310_v46 }
 0x27c   : > { %v1312_v48 = vpop.eup %1311 }
 0x27d   : > { %951 = vst [vmem:[%s394_s20 + $0x10] sm:$0xff] %v1312_v48 }
 0x27e PF: > { %p17_p8 = scmp.ge.s32.totalorder %s1442_s29, 9   ;;  %s1680_s24 = smov %s1367_s25 }
 0x27f   : > { %s1681_s25 = smov %s1371_s26  ;;  %s1682_s26 = smov %s1452_s9 }
 0x280   : > { %s1683_s27 = smov %s1442_s29  ;;  %19 = sbr.rel (!%p17_p8) target bundleno = 3 (0x3), region = 106 }
 0x285   :  { %974 = vsyncpa [#allocation3], 1 }
 0x286   :  { %976 = vsyncpa [#allocation3 + $0x1], 1 }

</bundles_post_ra>
